<compile_context>
chip_gen: v7x
topology: tpu7x:2x2x1
jax: 0.10.0
libtpu: 0.0.40
codegen_flags: <defaults>
</compile_context>

<pallas_src>
import functools
import math

import jax
import jax.numpy as jnp
from jax.experimental import pallas as pl
from jax.experimental.pallas import tpu as pltpu

_LANE = 128
_SUBLANE = 8


def _round_up(x, m):
    return ((x + m - 1) // m) * m


def _cdiv(a, b):
    return (a + b - 1) // b


def _vmem_budget_bytes():
    """~75% of physical VMEM: ~48 MiB on v7x (64 MiB/TC), ~96 MiB on v5e/v6e."""
    try:
        cap = int(pltpu.get_tpu_info().vmem_capacity_bytes)
    except Exception:
        cap = 64 * 1024 * 1024  # conservative default (v7x per-core)
    return (3 * cap) // 4


def _choose_tile_rows(M, d_pad, h_pad, in_itemsize, out_itemsize, requested,
                      vmem_budget, weight_bytes):
    """Pick a row-tile size that (a) fits the per-generation VMEM budget and
    (b) is balanced so padded garbage rows never exceed ~one sublane/tile
    (instead of up to TM-1 fully-computed rows)."""
    per_row = (2 * in_itemsize * d_pad        # x, double-buffered
               + 2 * out_itemsize * d_pad     # out, double-buffered
               + 4 * h_pad + 2 * h_pad        # (TM, 4D) f32 FFN act + bf16 copy
               + 8 * 4 * d_pad)               # h / attn / y / LN temporaries
    budget = max(vmem_budget - 2 * weight_bytes, per_row * _SUBLANE)
    cap = max(_SUBLANE, (budget // per_row) // _SUBLANE * _SUBLANE)
    target = max(_SUBLANE, (min(requested, cap) // _SUBLANE) * _SUBLANE)
    n_tiles = _cdiv(M, target)
    tm = _round_up(_cdiv(M, n_tiles), _SUBLANE)
    return tm, n_tiles


def _layer_kernel(x_ref,
                  wv_ref, bv_ref,
                  g1_ref, be1_ref,
                  w1_ref, b1_ref, w2_ref, b2_ref,
                  g2_ref, be2_ref,
                  o_ref, *, eps, d_actual, use_tanh_gelu):
    # ---- load row tile; f32 working precision, bf16 feed to the MXU ----
    x_in = x_ref[...]                                   # (TM, D_pad)
    x = x_in.astype(jnp.float32)
    x_bf = x_in.astype(jnp.bfloat16)

    d_pad = x.shape[-1]
    inv_d = 1.0 / float(d_actual)
    if d_pad != d_actual:
        lane = jax.lax.broadcasted_iota(jnp.int32, x.shape, 1)
        lane_mask = lane < d_actual
    else:
        lane_mask = None

    def layer_norm(v, g, b):
        # Statistics over the TRUE embed dim (padded lanes are exactly zero,
        # so the sum is unaffected; the variance masks the -mu contribution).
        mu = jnp.sum(v, axis=-1, keepdims=True) * inv_d
        diff = v - mu
        sq = diff * diff
        if lane_mask is not None:
            sq = jnp.where(lane_mask, sq, 0.0)
        var = jnp.sum(sq, axis=-1, keepdims=True) * inv_d
        # padded lanes of g/b are zero -> padded output lanes are exactly zero
        return diff * jax.lax.rsqrt(var + eps) * g + b

    # ---- attention: head_dim == 1  =>  softmax over singleton == 1
    #      =>  attention_output == V projection (exact). ----
    attn = jnp.dot(x_bf, wv_ref[...],
                   preferred_element_type=jnp.float32) + bv_ref[...]

    # ---- residual + LayerNorm 1 (dropout == identity in inference) ----
    h = layer_norm(x + attn, g1_ref[...], be1_ref[...])

    # ---- feed forward: Linear(D, 4D) -> GELU -> Linear(4D, D) ----
    f = jnp.dot(h.astype(jnp.bfloat16), w1_ref[...],
                preferred_element_type=jnp.float32) + b1_ref[...]
    if use_tanh_gelu:
        # EUP-friendly tanh approximation (optional, e.g. for v5e).
        f = 0.5 * f * (1.0 + jnp.tanh(0.7978845608028654
                                      * (f + 0.044715 * f * f * f)))
    else:
        # Exact erf GELU (matches nn.GELU()).
        f = 0.5 * f * (1.0 + jax.lax.erf(f * (1.0 / math.sqrt(2.0))))
    f = jnp.dot(f.astype(jnp.bfloat16), w2_ref[...],
                preferred_element_type=jnp.float32) + b2_ref[...]

    # ---- residual + LayerNorm 2 ----
    y = layer_norm(h + f, g2_ref[...], be2_ref[...])
    o_ref[...] = y.astype(o_ref.dtype)


def init_params(key, embed_dim):
    """Deterministic parameter init (PyTorch-Linear-style uniform bounds).

    q/k projection params are created for module parity, but the kernel does
    not consume them (they cannot influence the output when head_dim == 1)."""
    d, d4 = embed_dim, 4 * embed_dim
    ks = jax.random.split(key, 10)

    def lin(kw, kb, fan_in, shape_w, shape_b):
        bound = 1.0 / math.sqrt(fan_in)
        w = jax.random.uniform(kw, shape_w, jnp.float32, -bound, bound)
        b = jax.random.uniform(kb, shape_b, jnp.float32, -bound, bound)
        return w, b

    wq, bq = lin(ks[0], ks[1], d, (d, d), (1, d))
    wk, bk = lin(ks[2], ks[3], d, (d, d), (1, d))
    wv, bv = lin(ks[4], ks[5], d, (d, d), (1, d))
    w1, b1 = lin(ks[6], ks[7], d, (d, d4), (1, d4))
    w2, b2 = lin(ks[8], ks[9], d4, (d4, d), (1, d))
    g1, be1 = jnp.ones((1, d), jnp.float32), jnp.zeros((1, d), jnp.float32)
    g2, be2 = jnp.ones((1, d), jnp.float32), jnp.zeros((1, d), jnp.float32)
    return dict(wq=wq, bq=bq, wk=wk, bk=bk, wv=wv, bv=bv,
                g1=g1, be1=be1, w1=w1, b1=b1, w2=w2, b2=b2, g2=g2, be2=be2)


def graph_transformer_layer(x, edge_index, params, *, num_heads, eps=1e-5,
                            tile_rows=1024, out_dtype=jnp.bfloat16,
                            gelu="erf"):
    """x: (batch, num_nodes, embed_dim).  edge_index is unused by the reference
    attention math (accepted for signature parity).  out_dtype defaults to
    bf16 (halves store traffic); pass jnp.float32 for exact-dtype parity."""
    del edge_index
    B, N, D = x.shape
    if D % num_heads != 0:
        raise ValueError("embed_dim must be divisible by num_heads")
    if D // num_heads != 1:
        # The reference's attention_output.view(B, N, embed_dim) only
        # type-checks when head_dim == 1 (embed_dim == num_heads).
        raise ValueError("reference layer requires embed_dim == num_heads")

    # ---- lane-dense padded sizes ----
    D_pad = max(_round_up(D, _LANE), _LANE)
    H = 4 * D
    H_pad = max(_round_up(H, _LANE), _LANE)

    # ---- weights: bf16 matmul operands, f32 biases / LN params, zero-padded
    #      to lane multiples (one-time packing cost; pre-pack in production) --
    bf16 = jnp.bfloat16

    def pad2(a, r, c):
        return jnp.pad(a, ((0, r - a.shape[0]), (0, c - a.shape[1])))

    weight_args = [
        pad2(params["wv"], D_pad, D_pad).astype(bf16),
        pad2(params["bv"], 1, D_pad),
        pad2(params["g1"], 1, D_pad),
        pad2(params["be1"], 1, D_pad),
        pad2(params["w1"], D_pad, H_pad).astype(bf16),
        pad2(params["b1"], 1, H_pad),
        pad2(params["w2"], H_pad, D_pad).astype(bf16),
        pad2(params["b2"], 1, D_pad),
        pad2(params["g2"], 1, D_pad),
        pad2(params["be2"], 1, D_pad),
    ]
    weight_bytes = sum(int(a.size) * jnp.dtype(a.dtype).itemsize
                       for a in weight_args)

    # ---- per-generation VMEM budget and balanced row tile ----
    M = B * N
    in_itemsize = jnp.dtype(x.dtype).itemsize
    out_itemsize = jnp.dtype(out_dtype).itemsize
    vmem_budget = _vmem_budget_bytes()
    TM, n_tiles = _choose_tile_rows(M, D_pad, H_pad, in_itemsize, out_itemsize,
                                    tile_rows, vmem_budget, weight_bytes)
    M_pad = TM * n_tiles

    # ---- input slab: stream x in its incoming dtype (no wrapper bf16 cast);
    #      pad only when needed.  Padded rows produce finite garbage
    #      (rsqrt(var~0 + eps)) that is sliced off below; padded lanes are
    #      exactly zero because every weight/bias lane >= D is zero. ----
    x2 = x.reshape(M, D)
    if M_pad != M or D_pad != D:
        x2 = jnp.pad(x2, ((0, M_pad - M), (0, D_pad - D)))

    # ---- advisory cost estimate for XLA scheduling around the custom call --
    flops = 2 * M_pad * (D_pad * D_pad + 2 * D_pad * H_pad) + 30 * M_pad * D_pad
    transcendentals = M_pad * H_pad + 2 * M_pad
    bytes_accessed = (M_pad * D_pad * (in_itemsize + out_itemsize)
                      + weight_bytes)
    cost = pl.CostEstimate(flops=int(flops),
                           transcendentals=int(transcendentals),
                           bytes_accessed=int(bytes_accessed))

    kernel = functools.partial(_layer_kernel, eps=eps, d_actual=D,
                               use_tanh_gelu=(gelu == "tanh"))

    # TODO(synk): on v7x, dimension_semantics=("parallel",) keeps one copy of
    # the resident weights per TensorCore (64 MiB each); for very large D
    # consider VMEM_SHARED weight operands or splitting w1/w2 over the 4D axis.
    def _run(single_buffer_weights):
        if single_buffer_weights:
            # Constant index map -> never re-DMA'd; one buffer is enough and
            # halves the resident-weight VMEM footprint.
            def wspec(a):
                return pl.BlockSpec(a.shape, lambda i: (0, 0),
                                    pipeline_mode=pl.Buffered(1))
        else:
            def wspec(a):
                return pl.BlockSpec(a.shape, lambda i: (0, 0))

        return pl.pallas_call(
            kernel,
            grid=(n_tiles,),
            in_specs=[pl.BlockSpec((TM, D_pad), lambda i: (i, 0))]
                     + [wspec(a) for a in weight_args],
            out_specs=pl.BlockSpec((TM, D_pad), lambda i: (i, 0)),
            out_shape=jax.ShapeDtypeStruct((M_pad, D_pad), out_dtype),
            compiler_params=pltpu.CompilerParams(
                dimension_semantics=("parallel",),       # megacore-shardable
                vmem_limit_bytes=int(vmem_budget)),
            cost_estimate=cost,
        )(x2, *weight_args)

    try:
        out = _run(True)
    except Exception:
        # pipeline_mode=pl.Buffered(1) unsupported by this jax version; fall
        # back to default double-buffered weight operands (correctness same).
        out = _run(False)

    return out[:M, :D].reshape(B, N, D)


def _reference_forward(x, params, eps=1e-5):
    """Pure-JAX f32 reference mirroring the PyTorch math (head_dim == 1)."""
    B, N, D = x.shape
    x2 = x.reshape(B * N, D)

    def ln(v, g, b):
        mu = jnp.mean(v, axis=-1, keepdims=True)
        var = jnp.mean((v - mu) ** 2, axis=-1, keepdims=True)
        return (v - mu) * jax.lax.rsqrt(var + eps) * g + b

    q = x2 @ params["wq"] + params["bq"]
    k = x2 @ params["wk"] + params["bk"]
    v = x2 @ params["wv"] + params["bv"]
    scores = (q * k) / 1.0                       # head_dim == 1
    probs = jnp.exp(scores - scores)             # singleton softmax == 1
    attn = probs * v
    h = ln(x2 + attn, params["g1"], params["be1"])
    f = h @ params["w1"] + params["b1"]
    f = 0.5 * f * (1.0 + jax.lax.erf(f * (1.0 / math.sqrt(2.0))))
    f = f @ params["w2"] + params["b2"]
    y = ln(h + f, params["g2"], params["be2"])
    return y.reshape(B, N, D)


if __name__ == "__main__":
    key = jax.random.PRNGKey(0)
    k_x, k_e, k_p = jax.random.split(key, 3)

    # Small shapes consistent with the module; the reference's .view requires
    # embed_dim == num_heads (head_dim == 1).
    batch, num_nodes, embed_dim, num_heads = 2, 10, 64, 64
    num_edges = 20

    x = jax.random.normal(k_x, (batch, num_nodes, embed_dim), jnp.float32)
    edge_index = jax.random.randint(k_e, (2, num_edges), 0, num_nodes, jnp.int32)
    params = init_params(k_p, embed_dim)

    out = graph_transformer_layer(x, edge_index, params, num_heads=num_heads)
    out = jax.block_until_ready(out)

    assert out.shape == (batch, num_nodes, embed_dim)
    out_f32 = out.astype(jnp.float32)
    assert bool(jnp.all(jnp.isfinite(out_f32)))

    ref = _reference_forward(x, params)
    assert bool(jnp.allclose(out_f32, ref, atol=0.1, rtol=0.1))  # bf16 tol

    print("KERNEL_OK")
</pallas_src>

<mosaic_0001>
module attributes {stable_mosaic.version = 11 : i64} {
  func.func @_layer_kernel(%arg0: i32, %arg1: memref<24x128xf32, #tpu.memory_space<vmem>>, %arg2: memref<128x128xbf16, #tpu.memory_space<vmem>>, %arg3: memref<1x128xf32, #tpu.memory_space<vmem>>, %arg4: memref<1x128xf32, #tpu.memory_space<vmem>>, %arg5: memref<1x128xf32, #tpu.memory_space<vmem>>, %arg6: memref<128x256xbf16, #tpu.memory_space<vmem>>, %arg7: memref<1x256xf32, #tpu.memory_space<vmem>>, %arg8: memref<256x128xbf16, #tpu.memory_space<vmem>>, %arg9: memref<1x128xf32, #tpu.memory_space<vmem>>, %arg10: memref<1x128xf32, #tpu.memory_space<vmem>>, %arg11: memref<1x128xf32, #tpu.memory_space<vmem>>, %arg12: memref<24x128xbf16, #tpu.memory_space<vmem>>) attributes {dimension_semantics = [#tpu.dimension_semantics<parallel>], iteration_bounds = array<i64: 1>, scalar_prefetch = 0 : i64, scratch_operands = 0 : i64, tpu.core_type = #tpu.core_type<tc>, window_params = [{transform_indices = @transform_0, window_bounds = array<i64: 24, 128>}, {pipeline_mode = #tpu.pipeline_mode<synchronous>, transform_indices = @transform_1, window_bounds = array<i64: 128, 128>}, {pipeline_mode = #tpu.pipeline_mode<synchronous>, transform_indices = @transform_2, window_bounds = array<i64: 1, 128>}, {pipeline_mode = #tpu.pipeline_mode<synchronous>, transform_indices = @transform_3, window_bounds = array<i64: 1, 128>}, {pipeline_mode = #tpu.pipeline_mode<synchronous>, transform_indices = @transform_4, window_bounds = array<i64: 1, 128>}, {pipeline_mode = #tpu.pipeline_mode<synchronous>, transform_indices = @transform_5, window_bounds = array<i64: 128, 256>}, {pipeline_mode = #tpu.pipeline_mode<synchronous>, transform_indices = @transform_6, window_bounds = array<i64: 1, 256>}, {pipeline_mode = #tpu.pipeline_mode<synchronous>, transform_indices = @transform_7, window_bounds = array<i64: 256, 128>}, {pipeline_mode = #tpu.pipeline_mode<synchronous>, transform_indices = @transform_8, window_bounds = array<i64: 1, 128>}, {pipeline_mode = #tpu.pipeline_mode<synchronous>, transform_indices = @transform_9, window_bounds = array<i64: 1, 128>}, {pipeline_mode = #tpu.pipeline_mode<synchronous>, transform_indices = @transform_10, window_bounds = array<i64: 1, 128>}, {transform_indices = @transform_11, window_bounds = array<i64: 24, 128>}]} {
    %c0 = arith.constant 0 : index
    %c0_0 = arith.constant 0 : index
    %0 = vector.load %arg1[%c0, %c0_0] : memref<24x128xf32, #tpu.memory_space<vmem>>, vector<24x128xf32>
    %1 = arith.truncf %0 : vector<24x128xf32> to vector<24x128xbf16>
    %2 = tpu.iota {dimensions = array<i32: 1>} : vector<24x128xi32>
    %c64_i32 = arith.constant 64 : i32
    %3 = vector.broadcast %c64_i32 : i32 to vector<24x128xi32>
    %4 = arith.cmpi slt, %2, %3 : vector<24x128xi32>
    %c0_1 = arith.constant 0 : index
    %c0_2 = arith.constant 0 : index
    %5 = vector.load %arg2[%c0_1, %c0_2] : memref<128x128xbf16, #tpu.memory_space<vmem>>, vector<128x128xbf16>
    %cst = arith.constant dense<0.000000e+00> : vector<24x128xf32>
    %6 = tpu.matmul %1, %5, %cst {dimension_numbers = #tpu.dot_dimension_numbers<[1], [0], [0], [1], [0, 0, 1, 1], [], []>} : vector<24x128xbf16>, vector<128x128xbf16>, vector<24x128xf32> -> vector<24x128xf32>
    %c0_3 = arith.constant 0 : index
    %c0_4 = arith.constant 0 : index
    %7 = vector.load %arg3[%c0_3, %c0_4] : memref<1x128xf32, #tpu.memory_space<vmem>>, vector<1x128xf32>
    %8 = vector.broadcast %7 : vector<1x128xf32> to vector<24x128xf32>
    %9 = arith.addf %6, %8 : vector<24x128xf32>
    %10 = arith.addf %0, %9 : vector<24x128xf32>
    %c0_5 = arith.constant 0 : index
    %c0_6 = arith.constant 0 : index
    %11 = vector.load %arg4[%c0_5, %c0_6] : memref<1x128xf32, #tpu.memory_space<vmem>>, vector<1x128xf32>
    %c0_7 = arith.constant 0 : index
    %c0_8 = arith.constant 0 : index
    %12 = vector.load %arg5[%c0_7, %c0_8] : memref<1x128xf32, #tpu.memory_space<vmem>>, vector<1x128xf32>
    %cst_9 = arith.constant dense<0.000000e+00> : vector<24xf32>
    %13 = vector.multi_reduction <add>, %10, %cst_9 [1] : vector<24x128xf32> to vector<24xf32>
    %14 = vector.shape_cast %13 : vector<24xf32> to vector<24x1xf32>
    %cst_10 = arith.constant 1.562500e-02 : f32
    %15 = vector.broadcast %cst_10 : f32 to vector<24x1xf32>
    %16 = arith.mulf %14, %15 : vector<24x1xf32>
    %17 = vector.broadcast %16 : vector<24x1xf32> to vector<24x128xf32>
    %18 = arith.subf %10, %17 : vector<24x128xf32>
    %19 = arith.mulf %18, %18 : vector<24x128xf32>
    %cst_11 = arith.constant 0.000000e+00 : f32
    %20 = vector.broadcast %cst_11 : f32 to vector<24x128xf32>
    %21 = arith.select %4, %19, %20 : vector<24x128xi1>, vector<24x128xf32>
    %cst_12 = arith.constant dense<0.000000e+00> : vector<24xf32>
    %22 = vector.multi_reduction <add>, %21, %cst_12 [1] : vector<24x128xf32> to vector<24xf32>
    %23 = vector.shape_cast %22 : vector<24xf32> to vector<24x1xf32>
    %cst_13 = arith.constant 1.562500e-02 : f32
    %24 = vector.broadcast %cst_13 : f32 to vector<24x1xf32>
    %25 = arith.mulf %23, %24 : vector<24x1xf32>
    %cst_14 = arith.constant 9.99999974E-6 : f32
    %26 = vector.broadcast %cst_14 : f32 to vector<24x1xf32>
    %27 = arith.addf %25, %26 : vector<24x1xf32>
    %28 = math.rsqrt %27 : vector<24x1xf32>
    %29 = vector.broadcast %28 : vector<24x1xf32> to vector<24x128xf32>
    %30 = arith.mulf %18, %29 : vector<24x128xf32>
    %31 = vector.broadcast %11 : vector<1x128xf32> to vector<24x128xf32>
    %32 = arith.mulf %30, %31 : vector<24x128xf32>
    %33 = vector.broadcast %12 : vector<1x128xf32> to vector<24x128xf32>
    %34 = arith.addf %32, %33 : vector<24x128xf32>
    %35 = arith.truncf %34 : vector<24x128xf32> to vector<24x128xbf16>
    %c0_15 = arith.constant 0 : index
    %c0_16 = arith.constant 0 : index
    %36 = vector.load %arg6[%c0_15, %c0_16] : memref<128x256xbf16, #tpu.memory_space<vmem>>, vector<128x256xbf16>
    %cst_17 = arith.constant dense<0.000000e+00> : vector<24x256xf32>
    %37 = tpu.matmul %35, %36, %cst_17 {dimension_numbers = #tpu.dot_dimension_numbers<[1], [0], [0], [1], [0, 0, 1, 1], [], []>} : vector<24x128xbf16>, vector<128x256xbf16>, vector<24x256xf32> -> vector<24x256xf32>
    %c0_18 = arith.constant 0 : index
    %c0_19 = arith.constant 0 : index
    %38 = vector.load %arg7[%c0_18, %c0_19] : memref<1x256xf32, #tpu.memory_space<vmem>>, vector<1x256xf32>
    %39 = vector.broadcast %38 : vector<1x256xf32> to vector<24x256xf32>
    %40 = arith.addf %37, %39 : vector<24x256xf32>
    %cst_20 = arith.constant 5.000000e-01 : f32
    %41 = vector.broadcast %cst_20 : f32 to vector<24x256xf32>
    %42 = arith.mulf %41, %40 : vector<24x256xf32>
    %cst_21 = arith.constant 0.707106769 : f32
    %43 = vector.broadcast %cst_21 : f32 to vector<24x256xf32>
    %44 = arith.mulf %40, %43 : vector<24x256xf32>
    %45 = math.erf %44 : vector<24x256xf32>
    %cst_22 = arith.constant 1.000000e+00 : f32
    %46 = vector.broadcast %cst_22 : f32 to vector<24x256xf32>
    %47 = arith.addf %46, %45 : vector<24x256xf32>
    %48 = arith.mulf %42, %47 : vector<24x256xf32>
    %49 = arith.truncf %48 : vector<24x256xf32> to vector<24x256xbf16>
    %c0_23 = arith.constant 0 : index
    %c0_24 = arith.constant 0 : index
    %50 = vector.load %arg8[%c0_23, %c0_24] : memref<256x128xbf16, #tpu.memory_space<vmem>>, vector<256x128xbf16>
    %cst_25 = arith.constant dense<0.000000e+00> : vector<24x128xf32>
    %51 = tpu.matmul %49, %50, %cst_25 {dimension_numbers = #tpu.dot_dimension_numbers<[1], [0], [0], [1], [0, 0, 1, 1], [], []>} : vector<24x256xbf16>, vector<256x128xbf16>, vector<24x128xf32> -> vector<24x128xf32>
    %c0_26 = arith.constant 0 : index
    %c0_27 = arith.constant 0 : index
    %52 = vector.load %arg9[%c0_26, %c0_27] : memref<1x128xf32, #tpu.memory_space<vmem>>, vector<1x128xf32>
    %53 = vector.broadcast %52 : vector<1x128xf32> to vector<24x128xf32>
    %54 = arith.addf %51, %53 : vector<24x128xf32>
    %55 = arith.addf %34, %54 : vector<24x128xf32>
    %c0_28 = arith.constant 0 : index
    %c0_29 = arith.constant 0 : index
    %56 = vector.load %arg10[%c0_28, %c0_29] : memref<1x128xf32, #tpu.memory_space<vmem>>, vector<1x128xf32>
    %c0_30 = arith.constant 0 : index
    %c0_31 = arith.constant 0 : index
    %57 = vector.load %arg11[%c0_30, %c0_31] : memref<1x128xf32, #tpu.memory_space<vmem>>, vector<1x128xf32>
    %cst_32 = arith.constant dense<0.000000e+00> : vector<24xf32>
    %58 = vector.multi_reduction <add>, %55, %cst_32 [1] : vector<24x128xf32> to vector<24xf32>
    %59 = vector.shape_cast %58 : vector<24xf32> to vector<24x1xf32>
    %cst_33 = arith.constant 1.562500e-02 : f32
    %60 = vector.broadcast %cst_33 : f32 to vector<24x1xf32>
    %61 = arith.mulf %59, %60 : vector<24x1xf32>
    %62 = vector.broadcast %61 : vector<24x1xf32> to vector<24x128xf32>
    %63 = arith.subf %55, %62 : vector<24x128xf32>
    %64 = arith.mulf %63, %63 : vector<24x128xf32>
    %cst_34 = arith.constant 0.000000e+00 : f32
    %65 = vector.broadcast %cst_34 : f32 to vector<24x128xf32>
    %66 = arith.select %4, %64, %65 : vector<24x128xi1>, vector<24x128xf32>
    %cst_35 = arith.constant dense<0.000000e+00> : vector<24xf32>
    %67 = vector.multi_reduction <add>, %66, %cst_35 [1] : vector<24x128xf32> to vector<24xf32>
    %68 = vector.shape_cast %67 : vector<24xf32> to vector<24x1xf32>
    %cst_36 = arith.constant 1.562500e-02 : f32
    %69 = vector.broadcast %cst_36 : f32 to vector<24x1xf32>
    %70 = arith.mulf %68, %69 : vector<24x1xf32>
    %cst_37 = arith.constant 9.99999974E-6 : f32
    %71 = vector.broadcast %cst_37 : f32 to vector<24x1xf32>
    %72 = arith.addf %70, %71 : vector<24x1xf32>
    %73 = math.rsqrt %72 : vector<24x1xf32>
    %74 = vector.broadcast %73 : vector<24x1xf32> to vector<24x128xf32>
    %75 = arith.mulf %63, %74 : vector<24x128xf32>
    %76 = vector.broadcast %56 : vector<1x128xf32> to vector<24x128xf32>
    %77 = arith.mulf %75, %76 : vector<24x128xf32>
    %78 = vector.broadcast %57 : vector<1x128xf32> to vector<24x128xf32>
    %79 = arith.addf %77, %78 : vector<24x128xf32>
    %80 = arith.truncf %79 : vector<24x128xf32> to vector<24x128xbf16>
    %c0_38 = arith.constant 0 : index
    %c0_39 = arith.constant 0 : index
    %81 = vector.load %arg12[%c0_38, %c0_39] : memref<24x128xbf16, #tpu.memory_space<vmem>>, vector<24x128xbf16>
    tpu.vector_store %arg12[%c0_38, %c0_39], %80 {strides = array<i32>} : memref<24x128xbf16, #tpu.memory_space<vmem>>, vector<24x128xbf16>,
    return
  }
  func.func @transform_0(%arg0: i32) -> (i32, i32) {
    %c0_i32 = arith.constant 0 : i32
    %c0_i32_0 = arith.constant 0 : i32
    return %arg0, %c0_i32 : i32, i32
  }
  func.func @transform_1(%arg0: i32) -> (i32, i32) {
    %c0_i32 = arith.constant 0 : i32
    %c0_i32_0 = arith.constant 0 : i32
    %c0_i32_1 = arith.constant 0 : i32
    return %c0_i32, %c0_i32_0 : i32, i32
  }
  func.func @transform_2(%arg0: i32) -> (i32, i32) {
    %c0_i32 = arith.constant 0 : i32
    %c0_i32_0 = arith.constant 0 : i32
    %c0_i32_1 = arith.constant 0 : i32
    return %c0_i32, %c0_i32_0 : i32, i32
  }
  func.func @transform_3(%arg0: i32) -> (i32, i32) {
    %c0_i32 = arith.constant 0 : i32
    %c0_i32_0 = arith.constant 0 : i32
    %c0_i32_1 = arith.constant 0 : i32
    return %c0_i32, %c0_i32_0 : i32, i32
  }
  func.func @transform_4(%arg0: i32) -> (i32, i32) {
    %c0_i32 = arith.constant 0 : i32
    %c0_i32_0 = arith.constant 0 : i32
    %c0_i32_1 = arith.constant 0 : i32
    return %c0_i32, %c0_i32_0 : i32, i32
  }
  func.func @transform_5(%arg0: i32) -> (i32, i32) {
    %c0_i32 = arith.constant 0 : i32
    %c0_i32_0 = arith.constant 0 : i32
    %c0_i32_1 = arith.constant 0 : i32
    return %c0_i32, %c0_i32_0 : i32, i32
  }
  func.func @transform_6(%arg0: i32) -> (i32, i32) {
    %c0_i32 = arith.constant 0 : i32
    %c0_i32_0 = arith.constant 0 : i32
    %c0_i32_1 = arith.constant 0 : i32
    return %c0_i32, %c0_i32_0 : i32, i32
  }
  func.func @transform_7(%arg0: i32) -> (i32, i32) {
    %c0_i32 = arith.constant 0 : i32
    %c0_i32_0 = arith.constant 0 : i32
    %c0_i32_1 = arith.constant 0 : i32
    return %c0_i32, %c0_i32_0 : i32, i32
  }
  func.func @transform_8(%arg0: i32) -> (i32, i32) {
    %c0_i32 = arith.constant 0 : i32
    %c0_i32_0 = arith.constant 0 : i32
    %c0_i32_1 = arith.constant 0 : i32
    return %c0_i32, %c0_i32_0 : i32, i32
  }
  func.func @transform_9(%arg0: i32) -> (i32, i32) {
    %c0_i32 = arith.constant 0 : i32
    %c0_i32_0 = arith.constant 0 : i32
    %c0_i32_1 = arith.constant 0 : i32
    return %c0_i32, %c0_i32_0 : i32, i32
  }
  func.func @transform_10(%arg0: i32) -> (i32, i32) {
    %c0_i32 = arith.constant 0 : i32
    %c0_i32_0 = arith.constant 0 : i32
    %c0_i32_1 = arith.constant 0 : i32
    return %c0_i32, %c0_i32_0 : i32, i32
  }
  func.func @transform_11(%arg0: i32) -> (i32, i32) {
    %c0_i32 = arith.constant 0 : i32
    %c0_i32_0 = arith.constant 0 : i32
    return %arg0, %c0_i32 : i32, i32
  }
}

module attributes {stable_mosaic.version = 11 : i64} {
  func.func @_layer_kernel(%arg0: i32, %arg1: memref<24x128xf32, #tpu.memory_space<vmem>>, %arg2: memref<128x128xbf16, #tpu.memory_space<vmem>>, %arg3: memref<1x128xf32, #tpu.memory_space<vmem>>, %arg4: memref<1x128xf32, #tpu.memory_space<vmem>>, %arg5: memref<1x128xf32, #tpu.memory_space<vmem>>, %arg6: memref<128x256xbf16, #tpu.memory_space<vmem>>, %arg7: memref<1x256xf32, #tpu.memory_space<vmem>>, %arg8: memref<256x128xbf16, #tpu.memory_space<vmem>>, %arg9: memref<1x128xf32, #tpu.memory_space<vmem>>, %arg10: memref<1x128xf32, #tpu.memory_space<vmem>>, %arg11: memref<1x128xf32, #tpu.memory_space<vmem>>, %arg12: memref<24x128xbf16, #tpu.memory_space<vmem>>) attributes {dimension_semantics = [#tpu.dimension_semantics<parallel>], iteration_bounds = array<i64: 1>, scalar_prefetch = 0 : i64, scratch_operands = 0 : i64, tpu.core_type = #tpu.core_type<tc>, window_params = [{transform_indices = @transform_0, window_bounds = array<i64: 24, 128>}, {pipeline_mode = #tpu.pipeline_mode<synchronous>, transform_indices = @transform_1, window_bounds = array<i64: 128, 128>}, {pipeline_mode = #tpu.pipeline_mode<synchronous>, transform_indices = @transform_2, window_bounds = array<i64: 1, 128>}, {pipeline_mode = #tpu.pipeline_mode<synchronous>, transform_indices = @transform_3, window_bounds = array<i64: 1, 128>}, {pipeline_mode = #tpu.pipeline_mode<synchronous>, transform_indices = @transform_4, window_bounds = array<i64: 1, 128>}, {pipeline_mode = #tpu.pipeline_mode<synchronous>, transform_indices = @transform_5, window_bounds = array<i64: 128, 256>}, {pipeline_mode = #tpu.pipeline_mode<synchronous>, transform_indices = @transform_6, window_bounds = array<i64: 1, 256>}, {pipeline_mode = #tpu.pipeline_mode<synchronous>, transform_indices = @transform_7, window_bounds = array<i64: 256, 128>}, {pipeline_mode = #tpu.pipeline_mode<synchronous>, transform_indices = @transform_8, window_bounds = array<i64: 1, 128>}, {pipeline_mode = #tpu.pipeline_mode<synchronous>, transform_indices = @transform_9, window_bounds = array<i64: 1, 128>}, {pipeline_mode = #tpu.pipeline_mode<synchronous>, transform_indices = @transform_10, window_bounds = array<i64: 1, 128>}, {transform_indices = @transform_11, window_bounds = array<i64: 24, 128>}]} {
    %c0 = arith.constant 0 : index
    %c0_0 = arith.constant 0 : index
    %0 = vector.load %arg1[%c0, %c0_0] : memref<24x128xf32, #tpu.memory_space<vmem>>, vector<24x128xf32>
    %1 = arith.truncf %0 : vector<24x128xf32> to vector<24x128xbf16>
    %2 = tpu.iota {dimensions = array<i32: 1>} : vector<24x128xi32>
    %c64_i32 = arith.constant 64 : i32
    %3 = vector.broadcast %c64_i32 : i32 to vector<24x128xi32>
    %4 = arith.cmpi slt, %2, %3 : vector<24x128xi32>
    %c0_1 = arith.constant 0 : index
    %c0_2 = arith.constant 0 : index
    %5 = vector.load %arg2[%c0_1, %c0_2] : memref<128x128xbf16, #tpu.memory_space<vmem>>, vector<128x128xbf16>
    %cst = arith.constant dense<0.000000e+00> : vector<24x128xf32>
    %6 = tpu.matmul %1, %5, %cst {dimension_numbers = #tpu.dot_dimension_numbers<[1], [0], [0], [1], [0, 0, 1, 1], [], []>} : vector<24x128xbf16>, vector<128x128xbf16>, vector<24x128xf32> -> vector<24x128xf32>
    %c0_3 = arith.constant 0 : index
    %c0_4 = arith.constant 0 : index
    %7 = vector.load %arg3[%c0_3, %c0_4] : memref<1x128xf32, #tpu.memory_space<vmem>>, vector<1x128xf32>
    %8 = vector.broadcast %7 : vector<1x128xf32> to vector<24x128xf32>
    %9 = arith.addf %6, %8 : vector<24x128xf32>
    %10 = arith.addf %0, %9 : vector<24x128xf32>
    %c0_5 = arith.constant 0 : index
    %c0_6 = arith.constant 0 : index
    %11 = vector.load %arg4[%c0_5, %c0_6] : memref<1x128xf32, #tpu.memory_space<vmem>>, vector<1x128xf32>
    %c0_7 = arith.constant 0 : index
    %c0_8 = arith.constant 0 : index
    %12 = vector.load %arg5[%c0_7, %c0_8] : memref<1x128xf32, #tpu.memory_space<vmem>>, vector<1x128xf32>
    %cst_9 = arith.constant dense<0.000000e+00> : vector<24xf32>
    %13 = vector.multi_reduction <add>, %10, %cst_9 [1] : vector<24x128xf32> to vector<24xf32>
    %14 = vector.shape_cast %13 : vector<24xf32> to vector<24x1xf32>
    %cst_10 = arith.constant 1.562500e-02 : f32
    %15 = vector.broadcast %cst_10 : f32 to vector<24x1xf32>
    %16 = arith.mulf %14, %15 : vector<24x1xf32>
    %17 = vector.broadcast %16 : vector<24x1xf32> to vector<24x128xf32>
    %18 = arith.subf %10, %17 : vector<24x128xf32>
    %19 = arith.mulf %18, %18 : vector<24x128xf32>
    %cst_11 = arith.constant 0.000000e+00 : f32
    %20 = vector.broadcast %cst_11 : f32 to vector<24x128xf32>
    %21 = arith.select %4, %19, %20 : vector<24x128xi1>, vector<24x128xf32>
    %cst_12 = arith.constant dense<0.000000e+00> : vector<24xf32>
    %22 = vector.multi_reduction <add>, %21, %cst_12 [1] : vector<24x128xf32> to vector<24xf32>
    %23 = vector.shape_cast %22 : vector<24xf32> to vector<24x1xf32>
    %cst_13 = arith.constant 1.562500e-02 : f32
    %24 = vector.broadcast %cst_13 : f32 to vector<24x1xf32>
    %25 = arith.mulf %23, %24 : vector<24x1xf32>
    %cst_14 = arith.constant 9.99999974E-6 : f32
    %26 = vector.broadcast %cst_14 : f32 to vector<24x1xf32>
    %27 = arith.addf %25, %26 : vector<24x1xf32>
    %28 = math.rsqrt %27 : vector<24x1xf32>
    %29 = vector.broadcast %28 : vector<24x1xf32> to vector<24x128xf32>
    %30 = arith.mulf %18, %29 : vector<24x128xf32>
    %31 = vector.broadcast %11 : vector<1x128xf32> to vector<24x128xf32>
    %32 = arith.mulf %30, %31 : vector<24x128xf32>
    %33 = vector.broadcast %12 : vector<1x128xf32> to vector<24x128xf32>
    %34 = arith.addf %32, %33 : vector<24x128xf32>
    %35 = arith.truncf %34 : vector<24x128xf32> to vector<24x128xbf16>
    %c0_15 = arith.constant 0 : index
    %c0_16 = arith.constant 0 : index
    %36 = vector.load %arg6[%c0_15, %c0_16] : memref<128x256xbf16, #tpu.memory_space<vmem>>, vector<128x256xbf16>
    %cst_17 = arith.constant dense<0.000000e+00> : vector<24x256xf32>
    %37 = tpu.matmul %35, %36, %cst_17 {dimension_numbers = #tpu.dot_dimension_numbers<[1], [0], [0], [1], [0, 0, 1, 1], [], []>} : vector<24x128xbf16>, vector<128x256xbf16>, vector<24x256xf32> -> vector<24x256xf32>
    %c0_18 = arith.constant 0 : index
    %c0_19 = arith.constant 0 : index
    %38 = vector.load %arg7[%c0_18, %c0_19] : memref<1x256xf32, #tpu.memory_space<vmem>>, vector<1x256xf32>
    %39 = vector.broadcast %38 : vector<1x256xf32> to vector<24x256xf32>
    %40 = arith.addf %37, %39 : vector<24x256xf32>
    %cst_20 = arith.constant 5.000000e-01 : f32
    %41 = vector.broadcast %cst_20 : f32 to vector<24x256xf32>
    %42 = arith.mulf %41, %40 : vector<24x256xf32>
    %cst_21 = arith.constant 0.707106769 : f32
    %43 = vector.broadcast %cst_21 : f32 to vector<24x256xf32>
    %44 = arith.mulf %40, %43 : vector<24x256xf32>
    %45 = math.erf %44 : vector<24x256xf32>
    %cst_22 = arith.constant 1.000000e+00 : f32
    %46 = vector.broadcast %cst_22 : f32 to vector<24x256xf32>
    %47 = arith.addf %46, %45 : vector<24x256xf32>
    %48 = arith.mulf %42, %47 : vector<24x256xf32>
    %49 = arith.truncf %48 : vector<24x256xf32> to vector<24x256xbf16>
    %c0_23 = arith.constant 0 : index
    %c0_24 = arith.constant 0 : index
    %50 = vector.load %arg8[%c0_23, %c0_24] : memref<256x128xbf16, #tpu.memory_space<vmem>>, vector<256x128xbf16>
    %cst_25 = arith.constant dense<0.000000e+00> : vector<24x128xf32>
    %51 = tpu.matmul %49, %50, %cst_25 {dimension_numbers = #tpu.dot_dimension_numbers<[1], [0], [0], [1], [0, 0, 1, 1], [], []>} : vector<24x256xbf16>, vector<256x128xbf16>, vector<24x128xf32> -> vector<24x128xf32>
    %c0_26 = arith.constant 0 : index
    %c0_27 = arith.constant 0 : index
    %52 = vector.load %arg9[%c0_26, %c0_27] : memref<1x128xf32, #tpu.memory_space<vmem>>, vector<1x128xf32>
    %53 = vector.broadcast %52 : vector<1x128xf32> to vector<24x128xf32>
    %54 = arith.addf %51, %53 : vector<24x128xf32>
    %55 = arith.addf %34, %54 : vector<24x128xf32>
    %c0_28 = arith.constant 0 : index
    %c0_29 = arith.constant 0 : index
    %56 = vector.load %arg10[%c0_28, %c0_29] : memref<1x128xf32, #tpu.memory_space<vmem>>, vector<1x128xf32>
    %c0_30 = arith.constant 0 : index
    %c0_31 = arith.constant 0 : index
    %57 = vector.load %arg11[%c0_30, %c0_31] : memref<1x128xf32, #tpu.memory_space<vmem>>, vector<1x128xf32>
    %cst_32 = arith.constant dense<0.000000e+00> : vector<24xf32>
    %58 = vector.multi_reduction <add>, %55, %cst_32 [1] : vector<24x128xf32> to vector<24xf32>
    %59 = vector.shape_cast %58 : vector<24xf32> to vector<24x1xf32>
    %cst_33 = arith.constant 1.562500e-02 : f32
    %60 = vector.broadcast %cst_33 : f32 to vector<24x1xf32>
    %61 = arith.mulf %59, %60 : vector<24x1xf32>
    %62 = vector.broadcast %61 : vector<24x1xf32> to vector<24x128xf32>
    %63 = arith.subf %55, %62 : vector<24x128xf32>
    %64 = arith.mulf %63, %63 : vector<24x128xf32>
    %cst_34 = arith.constant 0.000000e+00 : f32
    %65 = vector.broadcast %cst_34 : f32 to vector<24x128xf32>
    %66 = arith.select %4, %64, %65 : vector<24x128xi1>, vector<24x128xf32>
    %cst_35 = arith.constant dense<0.000000e+00> : vector<24xf32>
    %67 = vector.multi_reduction <add>, %66, %cst_35 [1] : vector<24x128xf32> to vector<24xf32>
    %68 = vector.shape_cast %67 : vector<24xf32> to vector<24x1xf32>
    %cst_36 = arith.constant 1.562500e-02 : f32
    %69 = vector.broadcast %cst_36 : f32 to vector<24x1xf32>
    %70 = arith.mulf %68, %69 : vector<24x1xf32>
    %cst_37 = arith.constant 9.99999974E-6 : f32
    %71 = vector.broadcast %cst_37 : f32 to vector<24x1xf32>
    %72 = arith.addf %70, %71 : vector<24x1xf32>
    %73 = math.rsqrt %72 : vector<24x1xf32>
    %74 = vector.broadcast %73 : vector<24x1xf32> to vector<24x128xf32>
    %75 = arith.mulf %63, %74 : vector<24x128xf32>
    %76 = vector.broadcast %56 : vector<1x128xf32> to vector<24x128xf32>
    %77 = arith.mulf %75, %76 : vector<24x128xf32>
    %78 = vector.broadcast %57 : vector<1x128xf32> to vector<24x128xf32>
    %79 = arith.addf %77, %78 : vector<24x128xf32>
    %80 = arith.truncf %79 : vector<24x128xf32> to vector<24x128xbf16>
    %c0_38 = arith.constant 0 : index
    %c0_39 = arith.constant 0 : index
    %81 = vector.load %arg12[%c0_38, %c0_39] : memref<24x128xbf16, #tpu.memory_space<vmem>>, vector<24x128xbf16>
    tpu.vector_store %arg12[%c0_38, %c0_39], %80 {strides = array<i32>} : memref<24x128xbf16, #tpu.memory_space<vmem>>, vector<24x128xbf16>,
    return
  }
  func.func @transform_0(%arg0: i32) -> (i32, i32) {
    %c0_i32 = arith.constant 0 : i32
    %c0_i32_0 = arith.constant 0 : i32
    return %arg0, %c0_i32 : i32, i32
  }
  func.func @transform_1(%arg0: i32) -> (i32, i32) {
    %c0_i32 = arith.constant 0 : i32
    %c0_i32_0 = arith.constant 0 : i32
    %c0_i32_1 = arith.constant 0 : i32
    return %c0_i32, %c0_i32_0 : i32, i32
  }
  func.func @transform_2(%arg0: i32) -> (i32, i32) {
    %c0_i32 = arith.constant 0 : i32
    %c0_i32_0 = arith.constant 0 : i32
    %c0_i32_1 = arith.constant 0 : i32
    return %c0_i32, %c0_i32_0 : i32, i32
  }
  func.func @transform_3(%arg0: i32) -> (i32, i32) {
    %c0_i32 = arith.constant 0 : i32
    %c0_i32_0 = arith.constant 0 : i32
    %c0_i32_1 = arith.constant 0 : i32
    return %c0_i32, %c0_i32_0 : i32, i32
  }
  func.func @transform_4(%arg0: i32) -> (i32, i32) {
    %c0_i32 = arith.constant 0 : i32
    %c0_i32_0 = arith.constant 0 : i32
    %c0_i32_1 = arith.constant 0 : i32
    return %c0_i32, %c0_i32_0 : i32, i32
  }
  func.func @transform_5(%arg0: i32) -> (i32, i32) {
    %c0_i32 = arith.constant 0 : i32
    %c0_i32_0 = arith.constant 0 : i32
    %c0_i32_1 = arith.constant 0 : i32
    return %c0_i32, %c0_i32_0 : i32, i32
  }
  func.func @transform_6(%arg0: i32) -> (i32, i32) {
    %c0_i32 = arith.constant 0 : i32
    %c0_i32_0 = arith.constant 0 : i32
    %c0_i32_1 = arith.constant 0 : i32
    return %c0_i32, %c0_i32_0 : i32, i32
  }
  func.func @transform_7(%arg0: i32) -> (i32, i32) {
    %c0_i32 = arith.constant 0 : i32
    %c0_i32_0 = arith.constant 0 : i32
    %c0_i32_1 = arith.constant 0 : i32
    return %c0_i32, %c0_i32_0 : i32, i32
  }
  func.func @transform_8(%arg0: i32) -> (i32, i32) {
    %c0_i32 = arith.constant 0 : i32
    %c0_i32_0 = arith.constant 0 : i32
    %c0_i32_1 = arith.constant 0 : i32
    return %c0_i32, %c0_i32_0 : i32, i32
  }
  func.func @transform_9(%arg0: i32) -> (i32, i32) {
    %c0_i32 = arith.constant 0 : i32
    %c0_i32_0 = arith.constant 0 : i32
    %c0_i32_1 = arith.constant 0 : i32
    return %c0_i32, %c0_i32_0 : i32, i32
  }
  func.func @transform_10(%arg0: i32) -> (i32, i32) {
    %c0_i32 = arith.constant 0 : i32
    %c0_i32_0 = arith.constant 0 : i32
    %c0_i32_1 = arith.constant 0 : i32
    return %c0_i32, %c0_i32_0 : i32, i32
  }
  func.func @transform_11(%arg0: i32) -> (i32, i32) {
    %c0_i32 = arith.constant 0 : i32
    %c0_i32_0 = arith.constant 0 : i32
    return %arg0, %c0_i32 : i32, i32
  }
}

</mosaic_0001>

<bundles_post_ra>
// kernel: tpu_custom_call.1
= control target key start
LH: loop header
LB: loop body
LE: loop exit
PB: predicated region body
PF: predicated region fallthrough
CT: control target
= control target key end

     0   :  { %16 = vsyncpa [#allocation3], 0  ;;  %s1296_s0 = inlined_call_operand.hbm [shape: f32[24,128], index: 0, kind: input, shape index: {}]   ;;  %s1297_s1 = inlined_call_operand.hbm [shape: bf16[128,128], index: 1, kind: input, shape index: {}]   ;;  %s1298_s2 = inlined_call_operand.vmem [shape: f32[1,128], index: 2, kind: input, shape index: {}]   ;;  %s1299_s3 = inlined_call_operand.vmem [shape: f32[1,128], index: 3, kind: input, shape index: {}]   ;;  %s1300_s4 = inlined_call_operand.vmem [shape: f32[1,128], index: 4, kind: input, shape index: {}]   ;;  %s1301_s5 = inlined_call_operand.hbm [shape: bf16[128,256], index: 5, kind: input, shape index: {}]   ;;  %s1302_s6 = inlined_call_operand.vmem [shape: f32[1,256], index: 6, kind: input, shape index: {}]   ;;  %s1303_s7 = inlined_call_operand.hbm [shape: bf16[256,128], index: 7, kind: input, shape index: {}]   ;;  %s1304_s8 = inlined_call_operand.vmem [shape: f32[1,128], index: 8, kind: input, shape index: {}]   ;;  %s1305_s9 = inlined_call_operand.vmem [shape: f32[1,128], index: 9, kind: input, shape index: {}]   ;;  %s1306_s10 = inlined_call_operand.vmem [shape: f32[1,128], index: 10, kind: input, shape index: {}]   ;;  %s1307_s11 = inlined_call_operand.hbm [shape: bf16[24,128], index: 11, kind: output, shape index: {}]  }
   0x1   :  { %17 = vsyncpa [#allocation6], 0 }
   0x2   :  { %18 = vsyncpa [#allocation9], 0 }
   0x3   :  { %19 = vsyncpa [#allocation4], 0  ;;  %s1084_s17 = smov [#allocation5]   ;;  %s966_s21 = scalar_lea.hbm %s1297_s1, 1024 }
   0x4   :  { %s37_s18 = sshll.u32 %s1084_s17, 4  ;;  %p967_p0 = scmp.ne.s32.totalorder %s1297_s1, %s966_s21  ;;  %s38_s18 = int_to_ptr.vmem [resolvable:$true] %s37_s18 }
   0x5   :  { %p970_p1 = scmp.lt.u32.totalorder %s966_s21, %s1297_s1 }
   0x7   :  { %p972_p2 = pnand %p970_p1, %p967_p0 }
   0x9   :  { %975 = shalt.err (!%p972_p2)
}
   0xa   :  { %s976_s26 = scalar_lea.vmem %s38_s18, 1024  ;;  %p981_p4 = scmp.lt.s32.totalorder %s38_s18, %s38_s18 }
   0xb   :  { %p977_p3 = scmp.ne.s32.totalorder %s38_s18, %s976_s26  ;;  %p982_p5 = scmp.lt.s32.totalorder %s976_s26, %s976_s26 }
   0xd   :  { %p983_p6 = por %p982_p5, %p981_p4 }
   0xf   :  { %p984_p7 = pnand %p983_p6, %p977_p3 }
  0x11   :  { %987 = shalt.err (!%p984_p7)
}
  0x12   :  { %s1085_s27 = smov 64   ;;  %s1086_s28 = smov 4  }
  0x13   :  { %43 = dma.hbm_to_vmem [thread:$0]  %s1297_s1, 1024, %s38_s18, [#allocation6], %s1085_s27, %s1085_s27, %s1086_s28  }
  0x14   :  { %s1087_s12 = smov [#allocation2]   ;;  %s988_s16 = scalar_lea.hbm %s1296_s0, 384 }
  0x15   :  { %s25_s13 = sshll.u32 %s1087_s12, 4  ;;  %p989_p8 = scmp.ne.s32.totalorder %s1296_s0, %s988_s16  ;;  %s26_s13 = int_to_ptr.vmem [resolvable:$true] %s25_s13 }
  0x16   :  { %p992_p9 = scmp.lt.u32.totalorder %s988_s16, %s1296_s0 }
  0x18   :  { %p994_p10 = pnand %p992_p9, %p989_p8 }
  0x1a   :  { %997 = shalt.err (!%p994_p10)
}
  0x1b   :  { %s998_s22 = scalar_lea.vmem %s26_s13, 384  ;;  %p1003_p12 = scmp.lt.s32.totalorder %s26_s13, %s26_s13 }
  0x1c   :  { %p999_p11 = scmp.ne.s32.totalorder %s26_s13, %s998_s22  ;;  %p1004_p13 = scmp.lt.s32.totalorder %s998_s22, %s998_s22 }
  0x1e   :  { %p1005_p0 = por %p1004_p13, %p1003_p12 }
  0x20   :  { %p1006_p1 = pnand %p1005_p0, %p999_p11 }
  0x22   :  { %1009 = shalt.err (!%p1006_p1)
}
  0x23   :  { %s1088_s1 = smov 128   ;;  %s1089_s18 = smov 8  }
  0x24   :  { %31 = dma.hbm_to_vmem [thread:$0]  %s1296_s0, 384, %s26_s13, [#allocation3], %s1088_s1, %s1088_s1, %s1089_s18  }
  0x25   :  { %s1090_s25 = smov [#allocation7]   ;;  %s1091_s29 = smov [#allocation8]  }
  0x26   :  { %s55_s26 = sshll.u32 %s1090_s25, 4  ;;  %s69_s30 = sshll.u32 %s1091_s29, 4  ;;  %s56_s26 = int_to_ptr.vmem [resolvable:$true] %s55_s26  ;;  %s1181_s30 = int_to_ptr.vmem [resolvable:$true] %s69_s30 }
  0x27   :  { %s1010_s15 = scalar_lea.hbm %s1301_s5, 2048 }
  0x28   :  { %p1011_p2 = scmp.ne.s32.totalorder %s1301_s5, %s1010_s15  ;;  %p1014_p3 = scmp.lt.u32.totalorder %s1010_s15, %s1301_s5 }
  0x2a   :  { %p1016_p4 = pnand %p1014_p3, %p1011_p2 }
  0x2c   :  { %1019 = shalt.err (!%p1016_p4)
}
  0x2d   :  { %s1020_s0 = scalar_lea.vmem %s56_s26, 2048  ;;  %p1025_p6 = scmp.lt.s32.totalorder %s56_s26, %s56_s26 }
  0x2e   :  { %p1021_p5 = scmp.ne.s32.totalorder %s56_s26, %s1020_s0  ;;  %p1026_p7 = scmp.lt.s32.totalorder %s1020_s0, %s1020_s0 }
  0x30   :  { %p1027_p8 = por %p1026_p7, %p1025_p6 }
  0x32   :  { %p1028_p9 = pnand %p1027_p8, %p1021_p5 }
  0x34   :  { %1031 = shalt.err (!%p1028_p9)
}
  0x35   :  { %61 = dma.hbm_to_vmem [thread:$0]  %s1301_s5, 2048, %s56_s26, [#allocation6], %s1088_s1, %s1088_s1, %s1089_s18  }
  0x36   :  { %s1032_s24 = scalar_lea.hbm %s1303_s7, 2048 }
  0x37   :  { %p1033_p10 = scmp.ne.s32.totalorder %s1303_s7, %s1032_s24  ;;  %p1036_p11 = scmp.lt.u32.totalorder %s1032_s24, %s1303_s7 }
  0x39   :  { %p1038_p12 = pnand %p1036_p11, %p1033_p10 }
  0x3b   :  { %1041 = shalt.err (!%p1038_p12)
}
  0x3c   :  { %s1042_s15 = scalar_lea.vmem %s1181_s30, 2048  ;;  %p1047_p0 = scmp.lt.s32.totalorder %s1181_s30, %s1181_s30 }
  0x3d   :  { %p1043_p13 = scmp.ne.s32.totalorder %s1181_s30, %s1042_s15  ;;  %p1048_p1 = scmp.lt.s32.totalorder %s1042_s15, %s1042_s15 }
  0x3f   :  { %p1049_p2 = por %p1048_p1, %p1047_p0 }
  0x41   :  { %p1050_p3 = pnand %p1049_p2, %p1043_p13 }
  0x43   :  { %1053 = shalt.err (!%p1050_p3)
}
  0x44   :  { %75 = dma.hbm_to_vmem [thread:$0]  %s1303_s7, 2048, %s1181_s30, [#allocation9], %s1085_s27, %s1085_s27, %s1086_s28  }
  0x45   :  { %1076 = dma.done.wait [#allocation3], 384  }
  0x46   :  { %1077 = vsyncadd [#allocation3], 4294966912 }
  0x47   :  { %1078 = dma.done.wait [#allocation6], 3072  }
  0x48   :  { %1079 = vsyncadd [#allocation6], 4294964224 }
  0x49   :  { %1080 = dma.done.wait [#allocation9], 2048  }
  0x4a   :  { %1081 = vsyncadd [#allocation9], 4294965248  ;;  %v894_v0 = vld [vmem:[#allocation5] sm:$0xff]   ;;  %v895_v1 = vld [vmem:[#allocation5 + $0x8] sm:$0xff]   ;;  %v100_v27 = vlaneseq  ;;  %v1092_v52 = vmov 0   ;;  %s1093_s13 = smov [#allocation10]  }
  0x4b   :  { %848 = vmatprep.subr.bf16.mxu0 %v894_v0  ;;  %v896_v2 = vld [vmem:[#allocation5 + $0x10] sm:$0xff]   ;;  %v897_v3 = vld [vmem:[#allocation5 + $0x18] sm:$0xff]   ;;  %v95_v4 = vld [vmem:[#allocation2] sm:$0xff]  ;;  %423 = vmatprep.mubr.bf16.mxu1 %v1092_v52  ;;  %s739_s21 = sshll.u32 %s1093_s13, 4  ;;  %s740_s21 = int_to_ptr.vmem [resolvable:$true] %s739_s21 }
  0x4c   :  { %849 = vmatpush3.bf16.msra.mxu0 %v894_v0  ;;  %v96_v5 = vld [vmem:[#allocation2 + $0x8] sm:$0xff]  ;;  %v898_v7 = vld [vmem:[#allocation5 + $0x20] sm:$0xff]   ;;  %v899_v8 = vld [vmem:[#allocation5 + $0x28] sm:$0xff]   ;;  %v1219_v31 = vand.u32 127, %v100_v27  ;;  %p1059_p5 = scmp.lt.s32.totalorder %s740_s21, %s740_s21 }
  0x4d   :  { %850 = vmatprep.subr.bf16.mxu0 %v895_v1  ;;  %v98_v6 = vpack.c.bf16 %v96_v5, %v95_v4  ;;  %v900_v9 = vld [vmem:[#allocation5 + $0x30] sm:$0xff]   ;;  %v901_v10 = vld [vmem:[#allocation5 + $0x38] sm:$0xff]   ;;  %v753_v13 = vld [vmem:[%s1298_s2] ss:$0 sm:$0xff] }
  0x4e   :  { %v97_v11 = vld [vmem:[#allocation2 + $0x10] sm:$0xff]  ;;  %v902_v24 = vld [vmem:[#allocation7 + $0x4] ss:$8 sps:$4 sm:$0xff]   ;;  %v904_v25 = vld [vmem:[#allocation7] ss:$8 sps:$4 sm:$0xff]   ;;  %vm102_vm0 = vcmp.lt.s32.totalorder %v1219_v31, 64 }
  0x4f   :  { %864 = vmatprep.mubr.bf16.mxu0 %v98_v6  ;;  %v99_v12 = vpack.c.bf16 %v97_v11, %v97_v11  ;;  %v905_v26 = vld [vmem:[#allocation7 + $0x14] ss:$8 sps:$4 sm:$0xff]   ;;  %391 = vmatprep.subr.bf16.mxu1 %v902_v24  ;;  %v907_v44 = vld [vmem:[#allocation7 + $0x10] ss:$8 sps:$4 sm:$0xff]   ;;  %v908_v45 = vld [vmem:[#allocation7 + $0x24] ss:$8 sps:$4 sm:$0xff]  }
  0x50   :  { %851 = vmatpush3.bf16.msra.mxu0 %v895_v1  ;;  %392 = vmatpush1.bf16.msra.mxu1 %v904_v25  ;;  %v910_v46 = vld [vmem:[#allocation7 + $0x20] ss:$8 sps:$4 sm:$0xff]   ;;  %v911_v47 = vld [vmem:[#allocation7 + $0x34] ss:$8 sps:$4 sm:$0xff]   ;;  %v913_v48 = vld [vmem:[#allocation7 + $0x30] ss:$8 sps:$4 sm:$0xff]  }
  0x51   :  { %852 = vmatprep.subr.bf16.mxu0 %v896_v2  ;;  %393 = vmatprep.subr.bf16.mxu1 %v905_v26  ;;  %v914_v49 = vld [vmem:[#allocation7 + $0x44] ss:$8 sps:$4 sm:$0xff]   ;;  %v916_v50 = vld [vmem:[#allocation7 + $0x40] ss:$8 sps:$4 sm:$0xff]   ;;  %v917_v51 = vld [vmem:[#allocation7 + $0x54] ss:$8 sps:$4 sm:$0xff]  }
  0x52   :  { %v919_v53 = vld [vmem:[#allocation7 + $0x50] ss:$8 sps:$4 sm:$0xff]   ;;  %v920_v54 = vld [vmem:[#allocation7 + $0x64] ss:$8 sps:$4 sm:$0xff]   ;;  %v922_v55 = vld [vmem:[#allocation7 + $0x60] ss:$8 sps:$4 sm:$0xff]  }
  0x53   :  { %v923_v56 = vld [vmem:[#allocation7 + $0x74] ss:$8 sps:$4 sm:$0xff]   ;;  %v925_v57 = vld [vmem:[#allocation7 + $0x70] ss:$8 sps:$4 sm:$0xff]   ;;  %v926_v58 = vld [vmem:[#allocation8 + $0x40] sm:$0xff]  }
  0x54   :  { %853 = vmatpush3.bf16.msra.mxu0 %v896_v2  ;;  %394 = vmatpush1.bf16.msra.mxu1 %v907_v44  ;;  %v927_v59 = vld [vmem:[#allocation8] sm:$0xff]   ;;  %v928_v60 = vld [vmem:[#allocation8 + $0x48] sm:$0xff]   ;;  %v931_v24 = vld [vmem:[#allocation8 + $0x10] sm:$0xff]  }
  0x55   :  { %854 = vmatprep.subr.bf16.mxu0 %v897_v3  ;;  %395 = vmatprep.subr.bf16.mxu1 %v908_v45  ;;  %v929_v61 = vld [vmem:[#allocation8 + $0x8] sm:$0xff]   ;;  %v932_v25 = vld [vmem:[#allocation8 + $0x58] sm:$0xff]  }
  0x56   :  { %v933_v26 = vld [vmem:[#allocation8 + $0x18] sm:$0xff]  }
  0x58   :  { %855 = vmatpush3.bf16.msra.mxu0 %v897_v3  ;;  %396 = vmatpush1.bf16.msra.mxu1 %v910_v46 }
  0x59   :  { %856 = vmatprep.subr.bf16.mxu0 %v898_v7  ;;  %397 = vmatprep.subr.bf16.mxu1 %v911_v47 }
  0x5c   :  { %857 = vmatpush3.bf16.msra.mxu0 %v898_v7  ;;  %398 = vmatpush1.bf16.msra.mxu1 %v913_v48 }
  0x5d   :  { %858 = vmatprep.subr.bf16.mxu0 %v899_v8  ;;  %399 = vmatprep.subr.bf16.mxu1 %v914_v49 }
  0x60   :  { %859 = vmatpush3.bf16.msra.mxu0 %v899_v8  ;;  %400 = vmatpush1.bf16.msra.mxu1 %v916_v50 }
  0x61   :  { %860 = vmatprep.subr.bf16.mxu0 %v900_v9  ;;  %401 = vmatprep.subr.bf16.mxu1 %v917_v51 }
  0x64   :  { %861 = vmatpush3.bf16.msra.mxu0 %v900_v9  ;;  %402 = vmatpush1.bf16.msra.mxu1 %v919_v53  ;;  %v762_v9 = vld [vmem:[%s1299_s3] ss:$0 sm:$0xff] }
  0x65   :  { %862 = vmatprep.subr.bf16.mxu0 %v901_v10  ;;  %403 = vmatprep.subr.bf16.mxu1 %v920_v54 }
  0x68   :  { %863 = vmatpush3.bf16.msra.mxu0 %v901_v10  ;;  %404 = vmatpush1.bf16.msra.mxu1 %v922_v55 }
  0x69   :  { %405 = vmatprep.subr.bf16.mxu1 %v923_v56  ;;  %820 = vmatprep.subr.bf16.mxu0 %v926_v58 }
  0x6b   :  { %865 = vmatmul.mubr.bf16.vlgmr.msra.gmra.mrb[0].mxu0 %v99_v12 }
  0x6c   :  { %406 = vmatpush1.bf16.msra.mxu1 %v925_v57  ;;  %821 = vmatpush3.bf16.msra.mxu0 %v927_v59 }
  0x6d   :  { %868 = vmatprep.subr.bf16.mxu1 %v926_v58  ;;  %822 = vmatprep.subr.bf16.mxu0 %v928_v60 }
  0x70   :  { %823 = vmatpush3.bf16.msra.mxu0 %v929_v61 }
 0x13e   :  { %v866_v14 = vpop.f32.mrb[0].mxu0 }
 0x13f   :  { %v217_v15 = vadd.f32 %v866_v14, %v753_v13  ;;  %v208_v16 = vpop.f32.mrb[1].mxu0  ;;  %v763_v14 = vld [vmem:[%s1300_s4] ss:$0 sm:$0xff] }
 0x140   :  { %v209_v17 = vadd.f32 %v753_v13, %v208_v16  ;;  %v867_v18 = vpop.f32.mrb[2].mxu0 }
 0x141   :  { %v211_v19 = vpop.f32.mrb[3].mxu0  ;;  %v224_v20 = vadd.f32 %v217_v15, %v97_v11 }
 0x142   :  { %v212_v21 = vadd.f32 %v753_v13, %v211_v19  ;;  %v222_v22 = vadd.f32 %v209_v17, %v95_v4 }
 0x143   :  { %231 = vadd.xlane.f32.xlu1 %v224_v20 }
 0x144   :  { %227 = vadd.xlane.f32.xlu0 %v222_v22  ;;  %v223_v23 = vadd.f32 %v212_v21, %v96_v5 }
 0x148   :  { %229 = vadd.xlane.f32.xlu0 %v223_v23 }
 0x1d0   :  { %v232_v28 = vpop.xlane.xlu1 %231 }
 0x1d1   :  { %v235_v29 = vmul.f32 0.015625, %v232_v28  ;;  %v228_v30 = vpop.xlane.xlu0 %227  ;;  %v934_v28 = vld [vmem:[#allocation8 + $0x60] sm:$0xff]  }
 0x1d2   :  { %v233_v32 = vmul.f32 0.015625, %v228_v30  ;;  %v936_v30 = vld [vmem:[#allocation8 + $0x68] sm:$0xff]  }
 0x1d3   :  { %v1221_v33 = vsub.f32 %v224_v20, %v235_v29  ;;  %v935_v29 = vld [vmem:[#allocation8 + $0x20] sm:$0xff]  }
 0x1d4   :  { %v1223_v34 = vsub.f32 %v222_v22, %v233_v32  ;;  %v937_v32 = vld [vmem:[#allocation8 + $0x28] sm:$0xff]  }
 0x1d5   :  { %v230_v35 = vpop.xlane.xlu0 %229  ;;  %v241_v40 = vmul.f32 %v1221_v33, %v1221_v33 }
 0x1d6   :  { %v234_v36 = vmul.f32 0.015625, %v230_v35  ;;  %v239_v37 = vmul.f32 %v1223_v34, %v1223_v34  ;;  %v940_v35 = vld [vmem:[#allocation8 + $0x78] sm:$0xff]  }
 0x1d7   :  { %v244_v42 = vsel %vm102_vm0, %v241_v40, 0.0 }
 0x1d8   :  { %v1228_v38 = vsub.f32 %v223_v23, %v234_v36  ;;  %v242_v39 = vsel %vm102_vm0, %v239_v37, 0.0  ;;  %v930_v23 = vld [vmem:[#allocation8 + $0x50] sm:$0xff]   ;;  %v941_v36 = vld [vmem:[#allocation8 + $0x38] sm:$0xff]   ;;  %v302_v37 = vshrl.u32 %v100_v27, 7 }
 0x1d9   :  { %245 = vadd.xlane.f32.xlu1 %v242_v39  ;;  %824 = vmatprep.subr.bf16.mxu0 %v930_v23  ;;  %v299_v39 = vld [vmem:[%s1302_s6] sm:$0x3] }
 0x1da   :  { %v240_v41 = vmul.f32 %v1228_v38, %v1228_v38  ;;  %825 = vmatpush3.bf16.msra.mxu0 %v931_v24  ;;  %v307_v40 = vsub.s32 1, %v302_v37 }
 0x1db   :  { %826 = vmatprep.subr.bf16.mxu0 %v932_v25 }
 0x1dc   :  { %v243_v43 = vsel %vm102_vm0, %v240_v41, 0.0 }
 0x1dd   :  { %249 = vadd.xlane.f32.xlu1 %v244_v42  ;;  %247 = vadd.xlane.f32.xlu0 %v243_v43  ;;  %v308_v42 = vrot.slane %v299_v39, %v307_v40 }
 0x1de   :  { %827 = vmatpush3.bf16.msra.mxu0 %v933_v26 }
 0x1df   :  { %828 = vmatprep.subr.bf16.mxu0 %v934_v28 }
 0x1e2   :  { %829 = vmatpush3.bf16.msra.mxu0 %v935_v29 }
 0x1e3   :  { %830 = vmatprep.subr.bf16.mxu0 %v936_v30 }
 0x1e6   :  { %831 = vmatpush3.bf16.msra.mxu0 %v937_v32 }
 0x266   :  { %v246_v62 = vpop.xlane.xlu1 %245 }
 0x267   :  { %v251_v63 = vmul.f32 0.015625, %v246_v62 }
 0x269   :  { %v254_v0 = vadd.f32 1e-05, %v251_v63 }
 0x26a   :  { %v250_v1 = vpop.xlane.xlu1 %249  ;;  %v248_v2 = vpop.xlane.xlu0 %247 }
 0x26b   :  { %942 = vrsqrt.f32 %v254_v0  ;;  %v253_v3 = vmul.f32 0.015625, %v250_v1  ;;  %v252_v4 = vmul.f32 0.015625, %v248_v2 }
 0x26d   :  { %v256_v5 = vadd.f32 1e-05, %v253_v3  ;;  %v255_v6 = vadd.f32 1e-05, %v252_v4 }
 0x26f   :  { %944 = vrsqrt.f32 %v256_v5 }
 0x270   :  { %946 = vrsqrt.f32 %v255_v6 }
 0x275   :  { %v943_v7 = vpop.eup %942 }
 0x276   :  { %v260_v8 = vmul.f32 %v943_v7, %v1223_v34  ;;  %v939_v34 = vld [vmem:[#allocation8 + $0x30] sm:$0xff]  }
 0x278   :  { %v269_v13 = vmul.f32 %v762_v9, %v260_v8 }
 0x279   :  { %v945_v10 = vpop.eup %944 }
 0x27a   :  { %v947_v11 = vpop.eup %946  ;;  %v262_v16 = vmul.f32 %v945_v10, %v1221_v33  ;;  %v1249_v17 = vadd.f32 %v763_v14, %v269_v13  ;;  %v938_v33 = vld [vmem:[#allocation8 + $0x70] sm:$0xff]  }
 0x27b   :  { %v261_v12 = vmul.f32 %v947_v11, %v1228_v38  ;;  %832 = vmatprep.subr.bf16.mxu0 %v938_v33  ;;  %v303_v38 = vsub.s32 0, %v302_v37 }
 0x27c   :  { %v271_v20 = vmul.f32 %v762_v9, %v262_v16  ;;  %833 = vmatpush3.bf16.msra.mxu0 %v939_v34 }
 0x27d   :  { %v270_v15 = vmul.f32 %v762_v9, %v261_v12  ;;  %834 = vmatprep.subr.bf16.mxu0 %v940_v35  ;;  %v304_v41 = vrot.slane %v299_v39, %v303_v38 }
 0x27e   :  { %v1255_v21 = vadd.f32 %v763_v14, %v271_v20 }
 0x27f   :  { %v1251_v18 = vadd.f32 %v763_v14, %v270_v15 }
 0x280   :  { %v282_v22 = vpack.c.bf16 %v1255_v21, %v1255_v21  ;;  %835 = vmatpush3.bf16.msra.mxu0 %v941_v36 }
 0x281   :  { %v281_v19 = vpack.c.bf16 %v1251_v18, %v1249_v17 }
 0x283   :  { %424 = vmatmul.mubr.bf16.vlgmr.msra.gmra.mrb[0].mxu1 %v281_v19 }
 0x284   :  { %433 = vmatprep.mubr.bf16.mxu1 %v1092_v52  ;;  %876 = vmatpush3.bf16.msra.mxu1 %v927_v59 }
 0x285   :  { %869 = vmatprep.subr.bf16.mxu1 %v928_v60 }
 0x288   :  { %877 = vmatpush3.bf16.msra.mxu1 %v929_v61 }
 0x289   :  { %870 = vmatprep.subr.bf16.mxu1 %v930_v23 }
 0x28b   :  { %434 = vmatmul.mubr.bf16.gmra.mrb[4].mxu1 %v282_v22 }
 0x28c   :  { %878 = vmatpush3.bf16.msra.mxu1 %v931_v24 }
 0x28d   :  { %871 = vmatprep.subr.bf16.mxu1 %v932_v25 }
 0x290   :  { %879 = vmatpush3.bf16.msra.mxu1 %v933_v26 }
 0x291   :  { %872 = vmatprep.subr.bf16.mxu1 %v934_v28 }
 0x294   :  { %880 = vmatpush3.bf16.msra.mxu1 %v935_v29 }
 0x295   :  { %873 = vmatprep.subr.bf16.mxu1 %v936_v30 }
 0x298   :  { %881 = vmatpush3.bf16.msra.mxu1 %v937_v32  ;;  %v780_v32 = vld [vmem:[%s1304_s8] ss:$0 sm:$0xff] }
 0x299   :  { %874 = vmatprep.subr.bf16.mxu1 %v938_v33 }
 0x29c   :  { %882 = vmatpush3.bf16.msra.mxu1 %v939_v34 }
 0x29d   :  { %875 = vmatprep.subr.bf16.mxu1 %v940_v35 }
 0x2a0   :  { %883 = vmatpush3.bf16.msra.mxu1 %v941_v36 }
 0x356   :  { %v425_v43 = vpop.f32.mrb[0].mxu1 }
 0x357   :  { %v426_v44 = vadd.f32 %v425_v43, %v304_v41  ;;  %v427_v45 = vpop.f32.mrb[1].mxu1 }
 0x358   :  { %v428_v46 = vadd.f32 %v427_v45, %v308_v42  ;;  %v429_v47 = vpop.f32.mrb[2].mxu1 }
 0x359   :  { %v448_v48 = vmul.f32 0.70710677, %v426_v44  ;;  %v430_v49 = vadd.f32 %v429_v47, %v304_v41  ;;  %v431_v50 = vpop.f32.mrb[3].mxu1  ;;  %v442_v4 = vmul.f32 0.5, %v426_v44 }
 0x35a   :  { %v449_v51 = vmul.f32 0.70710677, %v428_v46  ;;  %v432_v52 = vadd.f32 %v431_v50, %v308_v42  ;;  %v443_v7 = vmul.f32 0.5, %v428_v46 }
 0x35b   :  { %948 = verf.f32 %v448_v48  ;;  %v450_v27 = vmul.f32 0.70710677, %v430_v49  ;;  %v444_v5 = vmul.f32 0.5, %v430_v49 }
 0x35c   :  { %950 = verf.f32 %v449_v51  ;;  %v451_v53 = vmul.f32 0.70710677, %v432_v52  ;;  %v445_v8 = vmul.f32 0.5, %v432_v52 }
 0x35d   :  { %952 = verf.f32 %v450_v27 }
 0x35e   :  { %954 = verf.f32 %v451_v53  ;;  %v435_v54 = vpop.f32.mrb[4].mxu1 }
 0x35f   :  { %v436_v55 = vadd.f32 %v435_v54, %v304_v41  ;;  %v437_v56 = vpop.f32.mrb[5].mxu1 }
 0x360   :  { %v438_v57 = vadd.f32 %v437_v56, %v308_v42  ;;  %v439_v58 = vpop.f32.mrb[6].mxu1 }
 0x361   :  { %v452_v59 = vmul.f32 0.70710677, %v436_v55  ;;  %v440_v60 = vpop.f32.mrb[7].mxu1  ;;  %v446_v20 = vmul.f32 0.5, %v436_v55 }
 0x362   :  { %v453_v61 = vmul.f32 0.70710677, %v438_v57  ;;  %v447_v23 = vmul.f32 0.5, %v438_v57 }
 0x363   :  { %956 = verf.f32 %v452_v59 }
 0x364   :  { %958 = verf.f32 %v453_v61 }
 0x365   :  { %v949_v62 = vpop.eup %948 }
 0x366   :  { %v951_v63 = vpop.eup %950  ;;  %v460_v0 = vadd.f32 1.0, %v949_v62 }
 0x367   :  { %v953_v1 = vpop.eup %952  ;;  %v461_v2 = vadd.f32 1.0, %v951_v63 }
 0x368   :  { %v955_v3 = vpop.eup %954  ;;  %v462_v6 = vadd.f32 1.0, %v953_v1  ;;  %v466_v10 = vmul.f32 %v460_v0, %v442_v4 }
 0x369   :  { %v463_v9 = vadd.f32 1.0, %v955_v3  ;;  %v467_v12 = vmul.f32 %v461_v2, %v443_v7 }
 0x36a   :  { %v468_v11 = vmul.f32 %v462_v6, %v444_v5  ;;  %v797_v6 = vld [vmem:[%s1305_s9] ss:$0 sm:$0xff]  ;;  %s1054_s9 = scalar_lea.vmem %s740_s21, 192 }
 0x36b   :  { %v469_v13 = vmul.f32 %v463_v9, %v445_v8  ;;  %p1055_p4 = scmp.ne.s32.totalorder %s740_s21, %s1054_s9  ;;  %p1060_p6 = scmp.lt.s32.totalorder %s1054_s9, %s1054_s9 }
 0x36c   :  { %v472_v14 = vpack.c.bf16 %v468_v11, %v466_v10  ;;  %v798_v10 = vld [vmem:[%s1306_s10] ss:$0 sm:$0xff] }
 0x36d   :  { %v957_v15 = vpop.eup %956  ;;  %v473_v16 = vpack.c.bf16 %v469_v13, %v467_v12  ;;  %p1061_p7 = por %p1060_p6, %p1059_p5 }
 0x36e   :  { %v959_v19 = vpop.eup %958  ;;  %v464_v22 = vadd.f32 1.0, %v957_v15 }
 0x36f   :  { %v465_v24 = vadd.f32 1.0, %v959_v19  ;;  %643 = vmatprep.mubr.bf16.mxu0 %v473_v16  ;;  %p1062_p8 = pnand %p1061_p7, %p1055_p4 }
 0x370   :  { %v470_v25 = vmul.f32 %v464_v22, %v446_v20  ;;  %644 = vmatmul.mubr.bf16.vlgmr.msra.gmra.mrb[4].mxu0 %v472_v14 }
 0x371   :  { %v471_v26 = vmul.f32 %v465_v24, %v447_v23 }
 0x372   :  { %v474_v29 = vpack.c.bf16 %v470_v25, %v470_v25 }
 0x373   :  { %v475_v28 = vpack.c.bf16 %v471_v26, %v471_v26 }
 0x375   :  { %651 = vmatprep.mubr.bf16.mxu1 %v475_v28 }
 0x376   :  { %652 = vmatmul.mubr.bf16.vlgmr.msra.gmra.mrb[8].mxu1 %v474_v29 }
 0x443   :  { %v836_v30 = vpop.f32.mrb[4].mxu0 }
 0x444   :  { %v837_v33 = vpop.f32.mrb[5].mxu0 }
 0x445   :  { %v838_v34 = vadd.f32 %v837_v33, %v836_v30  ;;  %v839_v35 = vpop.f32.mrb[6].mxu0 }
 0x446   :  { %v840_v36 = vpop.f32.mrb[7].mxu0 }
 0x447   :  { %v646_v37 = vadd.f32 %v838_v34, %v780_v32  ;;  %v841_v38 = vadd.f32 %v840_v36, %v839_v35 }
 0x449   :  { %v649_v39 = vadd.f32 %v841_v38, %v780_v32  ;;  %v842_v40 = vpop.f32.mrb[8].mxu1  ;;  %v659_v41 = vadd.f32 %v646_v37, %v1249_v17 }
 0x44a   :  { %v843_v42 = vpop.f32.mrb[9].mxu1 }
 0x44b   :  { %v844_v43 = vadd.f32 %v843_v42, %v842_v40  ;;  %v845_v44 = vpop.f32.mrb[10].mxu1  ;;  %664 = vadd.xlane.f32.xlu0 %v659_v41  ;;  %v660_v45 = vadd.f32 %v649_v39, %v1251_v18 }
 0x44c   :  { %v846_v46 = vpop.f32.mrb[11].mxu1 }
 0x44d   :  { %v654_v47 = vadd.f32 %v844_v43, %v780_v32  ;;  %666 = vadd.xlane.f32.xlu1 %v660_v45 }
 0x44f   :  { %v661_v48 = vadd.f32 %v654_v47, %v1255_v21 }
 0x451   :  { %668 = vadd.xlane.f32.xlu0 %v661_v48 }
 0x4d8   :  { %v665_v49 = vpop.xlane.xlu0 %664 }
 0x4d9   :  { %v670_v50 = vmul.f32 0.015625, %v665_v49 }
 0x4da   :  { %v667_v51 = vpop.xlane.xlu1 %666 }
 0x4db   :  { %v673_v52 = vsub.f32 %v659_v41, %v670_v50  ;;  %v671_v27 = vmul.f32 0.015625, %v667_v51 }
 0x4dd   :  { %v674_v53 = vsub.f32 %v660_v45, %v671_v27  ;;  %v676_v54 = vmul.f32 %v673_v52, %v673_v52 }
 0x4de   :  { %v669_v17 = vpop.xlane.xlu0 %668 }
 0x4df   :  { %v672_v55 = vmul.f32 0.015625, %v669_v17  ;;  %v679_v56 = vsel %vm102_vm0, %v676_v54, 0.0  ;;  %v677_v57 = vmul.f32 %v674_v53, %v674_v53 }
 0x4e0   :  { %682 = vadd.xlane.f32.xlu1 %v679_v56 }
 0x4e1   :  { %v675_v18 = vsub.f32 %v661_v48, %v672_v55  ;;  %v680_v58 = vsel %vm102_vm0, %v677_v57, 0.0 }
 0x4e2   :  { %684 = vadd.xlane.f32.xlu0 %v680_v58 }
 0x4e3   :  { %v678_v21 = vmul.f32 %v675_v18, %v675_v18 }
 0x4e5   :  { %v681_v59 = vsel %vm102_vm0, %v678_v21, 0.0 }
 0x4e6   :  { %686 = vadd.xlane.f32.xlu1 %v681_v59 }
 0x56d   :  { %v683_v60 = vpop.xlane.xlu1 %682 }
 0x56e   :  { %v688_v61 = vmul.f32 0.015625, %v683_v60 }
 0x56f   :  { %v685_v62 = vpop.xlane.xlu0 %684 }
 0x570   :  { %v691_v63 = vadd.f32 1e-05, %v688_v61  ;;  %v689_v0 = vmul.f32 0.015625, %v685_v62 }
 0x572   :  { %960 = vrsqrt.f32 %v691_v63  ;;  %v692_v1 = vadd.f32 1e-05, %v689_v0 }
 0x573   :  { %v687_v2 = vpop.xlane.xlu1 %686 }
 0x574   :  { %962 = vrsqrt.f32 %v692_v1  ;;  %v690_v3 = vmul.f32 0.015625, %v687_v2 }
 0x576   :  { %v693_v4 = vadd.f32 1e-05, %v690_v3 }
 0x578   :  { %964 = vrsqrt.f32 %v693_v4 }
 0x57c   :  { %v961_v5 = vpop.eup %960 }
 0x57d   :  { %v697_v31 = vmul.f32 %v961_v5, %v673_v52 }
 0x57e   :  { %v963_v7 = vpop.eup %962 }
 0x57f   :  { %v698_v8 = vmul.f32 %v963_v7, %v674_v53  ;;  %v706_v9 = vmul.f32 %v797_v6, %v697_v31 }
 0x581   :  { %v707_v11 = vmul.f32 %v797_v6, %v698_v8  ;;  %v715_v14 = vadd.f32 %v798_v10, %v706_v9 }
 0x582   :  { %v965_v12 = vpop.eup %964 }
 0x583   :  { %v699_v13 = vmul.f32 %v965_v12, %v675_v18  ;;  %v716_v15 = vadd.f32 %v798_v10, %v707_v11 }
 0x585   :  { %v708_v16 = vmul.f32 %v797_v6, %v699_v13  ;;  %v808_v19 = vpack.c.bf16 %v716_v15, %v715_v14 }
 0x587   :  { %v717_v20 = vadd.f32 %v798_v10, %v708_v16  ;;  %809 = vst [vmem:[#allocation10] sm:$0xff] %v808_v19  }
 0x589   :  { %v804_v22 = vpack.c.bf16 %v717_v20, %v717_v20 }
 0x58b   :  { %733 = vst [vmem:[#allocation10 + $0x8] sm:$0xf] %v804_v22 }
 0x58c   :  { %1065 = shalt.err (!%p1062_p8)
}
 0x58d   :  { %s1066_s23 = scalar_lea.hbm %s1307_s11, 192 }
 0x58e   :  { %p1067_p9 = scmp.ne.s32.totalorder %s1307_s11, %s1066_s23  ;;  %p1070_p10 = scmp.lt.u32.totalorder %s1066_s23, %s1307_s11 }
 0x590   :  { %p1072_p11 = pnand %p1070_p10, %p1067_p9 }
 0x592   :  { %1075 = shalt.err (!%p1072_p11)
}
 0x593   :  { %745 = dma.vmem_to_hbm [thread:$0]  %s740_s21, 192, %s1307_s11, [#allocation4], %s1085_s27, %s1085_s27, %s1086_s28  }
 0x594   :  { %1082 = dma.done.wait [#allocation4], 192  }
 0x595   :  { %1083 = vsyncadd [#allocation4], 4294967104 }
 0x596   :  { %749 = vsyncpa [#allocation3], 1 }
 0x597   :  { %750 = vsyncpa [#allocation6], 1 }
 0x598   :  { %751 = vsyncpa [#allocation9], 1 }
 0x599   :  { %752 = vsyncpa [#allocation4], 1 }

// kernel: tpu_custom_call.1
= control target key start
LH: loop header
LB: loop body
LE: loop exit
PB: predicated region body
PF: predicated region fallthrough
CT: control target
= control target key end

     0   :  { %16 = vsyncpa [#allocation3], 0  ;;  %s1296_s0 = inlined_call_operand.hbm [shape: f32[24,128], index: 0, kind: input, shape index: {}]   ;;  %s1297_s1 = inlined_call_operand.hbm [shape: bf16[128,128], index: 1, kind: input, shape index: {}]   ;;  %s1298_s2 = inlined_call_operand.vmem [shape: f32[1,128], index: 2, kind: input, shape index: {}]   ;;  %s1299_s3 = inlined_call_operand.vmem [shape: f32[1,128], index: 3, kind: input, shape index: {}]   ;;  %s1300_s4 = inlined_call_operand.vmem [shape: f32[1,128], index: 4, kind: input, shape index: {}]   ;;  %s1301_s5 = inlined_call_operand.hbm [shape: bf16[128,256], index: 5, kind: input, shape index: {}]   ;;  %s1302_s6 = inlined_call_operand.vmem [shape: f32[1,256], index: 6, kind: input, shape index: {}]   ;;  %s1303_s7 = inlined_call_operand.hbm [shape: bf16[256,128], index: 7, kind: input, shape index: {}]   ;;  %s1304_s8 = inlined_call_operand.vmem [shape: f32[1,128], index: 8, kind: input, shape index: {}]   ;;  %s1305_s9 = inlined_call_operand.vmem [shape: f32[1,128], index: 9, kind: input, shape index: {}]   ;;  %s1306_s10 = inlined_call_operand.vmem [shape: f32[1,128], index: 10, kind: input, shape index: {}]   ;;  %s1307_s11 = inlined_call_operand.hbm [shape: bf16[24,128], index: 11, kind: output, shape index: {}]  }
   0x1   :  { %17 = vsyncpa [#allocation6], 0 }
   0x2   :  { %18 = vsyncpa [#allocation9], 0 }
   0x3   :  { %19 = vsyncpa [#allocation4], 0  ;;  %s1084_s17 = smov [#allocation5]   ;;  %s966_s21 = scalar_lea.hbm %s1297_s1, 1024 }
   0x4   :  { %s37_s18 = sshll.u32 %s1084_s17, 4  ;;  %p967_p0 = scmp.ne.s32.totalorder %s1297_s1, %s966_s21  ;;  %s38_s18 = int_to_ptr.vmem [resolvable:$true] %s37_s18 }
   0x5   :  { %p970_p1 = scmp.lt.u32.totalorder %s966_s21, %s1297_s1 }
   0x7   :  { %p972_p2 = pnand %p970_p1, %p967_p0 }
   0x9   :  { %975 = shalt.err (!%p972_p2)
}
   0xa   :  { %s976_s26 = scalar_lea.vmem %s38_s18, 1024  ;;  %p981_p4 = scmp.lt.s32.totalorder %s38_s18, %s38_s18 }
   0xb   :  { %p977_p3 = scmp.ne.s32.totalorder %s38_s18, %s976_s26  ;;  %p982_p5 = scmp.lt.s32.totalorder %s976_s26, %s976_s26 }
   0xd   :  { %p983_p6 = por %p982_p5, %p981_p4 }
   0xf   :  { %p984_p7 = pnand %p983_p6, %p977_p3 }
  0x11   :  { %987 = shalt.err (!%p984_p7)
}
  0x12   :  { %s1085_s27 = smov 64   ;;  %s1086_s28 = smov 4  }
  0x13   :  { %43 = dma.hbm_to_vmem [thread:$0]  %s1297_s1, 1024, %s38_s18, [#allocation6], %s1085_s27, %s1085_s27, %s1086_s28  }
  0x14   :  { %s1087_s12 = smov [#allocation2]   ;;  %s988_s16 = scalar_lea.hbm %s1296_s0, 384 }
  0x15   :  { %s25_s13 = sshll.u32 %s1087_s12, 4  ;;  %p989_p8 = scmp.ne.s32.totalorder %s1296_s0, %s988_s16  ;;  %s26_s13 = int_to_ptr.vmem [resolvable:$true] %s25_s13 }
  0x16   :  { %p992_p9 = scmp.lt.u32.totalorder %s988_s16, %s1296_s0 }
  0x18   :  { %p994_p10 = pnand %p992_p9, %p989_p8 }
  0x1a   :  { %997 = shalt.err (!%p994_p10)
}
  0x1b   :  { %s998_s22 = scalar_lea.vmem %s26_s13, 384  ;;  %p1003_p12 = scmp.lt.s32.totalorder %s26_s13, %s26_s13 }
  0x1c   :  { %p999_p11 = scmp.ne.s32.totalorder %s26_s13, %s998_s22  ;;  %p1004_p13 = scmp.lt.s32.totalorder %s998_s22, %s998_s22 }
  0x1e   :  { %p1005_p0 = por %p1004_p13, %p1003_p12 }
  0x20   :  { %p1006_p1 = pnand %p1005_p0, %p999_p11 }
  0x22   :  { %1009 = shalt.err (!%p1006_p1)
}
  0x23   :  { %s1088_s1 = smov 128   ;;  %s1089_s18 = smov 8  }
  0x24   :  { %31 = dma.hbm_to_vmem [thread:$0]  %s1296_s0, 384, %s26_s13, [#allocation3], %s1088_s1, %s1088_s1, %s1089_s18  }
  0x25   :  { %s1090_s25 = smov [#allocation7]   ;;  %s1091_s29 = smov [#allocation8]  }
  0x26   :  { %s55_s26 = sshll.u32 %s1090_s25, 4  ;;  %s69_s30 = sshll.u32 %s1091_s29, 4  ;;  %s56_s26 = int_to_ptr.vmem [resolvable:$true] %s55_s26  ;;  %s1181_s30 = int_to_ptr.vmem [resolvable:$true] %s69_s30 }
  0x27   :  { %s1010_s15 = scalar_lea.hbm %s1301_s5, 2048 }
  0x28   :  { %p1011_p2 = scmp.ne.s32.totalorder %s1301_s5, %s1010_s15  ;;  %p1014_p3 = scmp.lt.u32.totalorder %s1010_s15, %s1301_s5 }
  0x2a   :  { %p1016_p4 = pnand %p1014_p3, %p1011_p2 }
  0x2c   :  { %1019 = shalt.err (!%p1016_p4)
}
  0x2d   :  { %s1020_s0 = scalar_lea.vmem %s56_s26, 2048  ;;  %p1025_p6 = scmp.lt.s32.totalorder %s56_s26, %s56_s26 }
  0x2e   :  { %p1021_p5 = scmp.ne.s32.totalorder %s56_s26, %s1020_s0  ;;  %p1026_p7 = scmp.lt.s32.totalorder %s1020_s0, %s1020_s0 }
  0x30   :  { %p1027_p8 = por %p1026_p7, %p1025_p6 }
  0x32   :  { %p1028_p9 = pnand %p1027_p8, %p1021_p5 }
  0x34   :  { %1031 = shalt.err (!%p1028_p9)
}
  0x35   :  { %61 = dma.hbm_to_vmem [thread:$0]  %s1301_s5, 2048, %s56_s26, [#allocation6], %s1088_s1, %s1088_s1, %s1089_s18  }
  0x36   :  { %s1032_s24 = scalar_lea.hbm %s1303_s7, 2048 }
  0x37   :  { %p1033_p10 = scmp.ne.s32.totalorder %s1303_s7, %s1032_s24  ;;  %p1036_p11 = scmp.lt.u32.totalorder %s1032_s24, %s1303_s7 }
  0x39   :  { %p1038_p12 = pnand %p1036_p11, %p1033_p10 }
  0x3b   :  { %1041 = shalt.err (!%p1038_p12)
}
  0x3c   :  { %s1042_s15 = scalar_lea.vmem %s1181_s30, 2048  ;;  %p1047_p0 = scmp.lt.s32.totalorder %s1181_s30, %s1181_s30 }
  0x3d   :  { %p1043_p13 = scmp.ne.s32.totalorder %s1181_s30, %s1042_s15  ;;  %p1048_p1 = scmp.lt.s32.totalorder %s1042_s15, %s1042_s15 }
  0x3f   :  { %p1049_p2 = por %p1048_p1, %p1047_p0 }
  0x41   :  { %p1050_p3 = pnand %p1049_p2, %p1043_p13 }
  0x43   :  { %1053 = shalt.err (!%p1050_p3)
}
  0x44   :  { %75 = dma.hbm_to_vmem [thread:$0]  %s1303_s7, 2048, %s1181_s30, [#allocation9], %s1085_s27, %s1085_s27, %s1086_s28  }
  0x45   :  { %1076 = dma.done.wait [#allocation3], 384  }
  0x46   :  { %1077 = vsyncadd [#allocation3], 4294966912 }
  0x47   :  { %1078 = dma.done.wait [#allocation6], 3072  }
  0x48   :  { %1079 = vsyncadd [#allocation6], 4294964224 }
  0x49   :  { %1080 = dma.done.wait [#allocation9], 2048  }
  0x4a   :  { %1081 = vsyncadd [#allocation9], 4294965248  ;;  %v894_v0 = vld [vmem:[#allocation5] sm:$0xff]   ;;  %v895_v1 = vld [vmem:[#allocation5 + $0x8] sm:$0xff]   ;;  %v100_v27 = vlaneseq  ;;  %v1092_v52 = vmov 0   ;;  %s1093_s13 = smov [#allocation10]  }
  0x4b   :  { %848 = vmatprep.subr.bf16.mxu0 %v894_v0  ;;  %v896_v2 = vld [vmem:[#allocation5 + $0x10] sm:$0xff]   ;;  %v897_v3 = vld [vmem:[#allocation5 + $0x18] sm:$0xff]   ;;  %v95_v4 = vld [vmem:[#allocation2] sm:$0xff]  ;;  %423 = vmatprep.mubr.bf16.mxu1 %v1092_v52  ;;  %s739_s21 = sshll.u32 %s1093_s13, 4  ;;  %s740_s21 = int_to_ptr.vmem [resolvable:$true] %s739_s21 }
  0x4c   :  { %849 = vmatpush3.bf16.msra.mxu0 %v894_v0  ;;  %v96_v5 = vld [vmem:[#allocation2 + $0x8] sm:$0xff]  ;;  %v898_v7 = vld [vmem:[#allocation5 + $0x20] sm:$0xff]   ;;  %v899_v8 = vld [vmem:[#allocation5 + $0x28] sm:$0xff]   ;;  %v1219_v31 = vand.u32 127, %v100_v27  ;;  %p1059_p5 = scmp.lt.s32.totalorder %s740_s21, %s740_s21 }
  0x4d   :  { %850 = vmatprep.subr.bf16.mxu0 %v895_v1  ;;  %v98_v6 = vpack.c.bf16 %v96_v5, %v95_v4  ;;  %v900_v9 = vld [vmem:[#allocation5 + $0x30] sm:$0xff]   ;;  %v901_v10 = vld [vmem:[#allocation5 + $0x38] sm:$0xff]   ;;  %v753_v13 = vld [vmem:[%s1298_s2] ss:$0 sm:$0xff] }
  0x4e   :  { %v97_v11 = vld [vmem:[#allocation2 + $0x10] sm:$0xff]  ;;  %v902_v24 = vld [vmem:[#allocation7 + $0x4] ss:$8 sps:$4 sm:$0xff]   ;;  %v904_v25 = vld [vmem:[#allocation7] ss:$8 sps:$4 sm:$0xff]   ;;  %vm102_vm0 = vcmp.lt.s32.totalorder %v1219_v31, 64 }
  0x4f   :  { %864 = vmatprep.mubr.bf16.mxu0 %v98_v6  ;;  %v99_v12 = vpack.c.bf16 %v97_v11, %v97_v11  ;;  %v905_v26 = vld [vmem:[#allocation7 + $0x14] ss:$8 sps:$4 sm:$0xff]   ;;  %391 = vmatprep.subr.bf16.mxu1 %v902_v24  ;;  %v907_v44 = vld [vmem:[#allocation7 + $0x10] ss:$8 sps:$4 sm:$0xff]   ;;  %v908_v45 = vld [vmem:[#allocation7 + $0x24] ss:$8 sps:$4 sm:$0xff]  }
  0x50   :  { %851 = vmatpush3.bf16.msra.mxu0 %v895_v1  ;;  %392 = vmatpush1.bf16.msra.mxu1 %v904_v25  ;;  %v910_v46 = vld [vmem:[#allocation7 + $0x20] ss:$8 sps:$4 sm:$0xff]   ;;  %v911_v47 = vld [vmem:[#allocation7 + $0x34] ss:$8 sps:$4 sm:$0xff]   ;;  %v913_v48 = vld [vmem:[#allocation7 + $0x30] ss:$8 sps:$4 sm:$0xff]  }
  0x51   :  { %852 = vmatprep.subr.bf16.mxu0 %v896_v2  ;;  %393 = vmatprep.subr.bf16.mxu1 %v905_v26  ;;  %v914_v49 = vld [vmem:[#allocation7 + $0x44] ss:$8 sps:$4 sm:$0xff]   ;;  %v916_v50 = vld [vmem:[#allocation7 + $0x40] ss:$8 sps:$4 sm:$0xff]   ;;  %v917_v51 = vld [vmem:[#allocation7 + $0x54] ss:$8 sps:$4 sm:$0xff]  }
  0x52   :  { %v919_v53 = vld [vmem:[#allocation7 + $0x50] ss:$8 sps:$4 sm:$0xff]   ;;  %v920_v54 = vld [vmem:[#allocation7 + $0x64] ss:$8 sps:$4 sm:$0xff]   ;;  %v922_v55 = vld [vmem:[#allocation7 + $0x60] ss:$8 sps:$4 sm:$0xff]  }
  0x53   :  { %v923_v56 = vld [vmem:[#allocation7 + $0x74] ss:$8 sps:$4 sm:$0xff]   ;;  %v925_v57 = vld [vmem:[#allocation7 + $0x70] ss:$8 sps:$4 sm:$0xff]   ;;  %v926_v58 = vld [vmem:[#allocation8 + $0x40] sm:$0xff]  }
  0x54   :  { %853 = vmatpush3.bf16.msra.mxu0 %v896_v2  ;;  %394 = vmatpush1.bf16.msra.mxu1 %v907_v44  ;;  %v927_v59 = vld [vmem:[#allocation8] sm:$0xff]   ;;  %v928_v60 = vld [vmem:[#allocation8 + $0x48] sm:$0xff]   ;;  %v931_v24 = vld [vmem:[#allocation8 + $0x10] sm:$0xff]  }
  0x55   :  { %854 = vmatprep.subr.bf16.mxu0 %v897_v3  ;;  %395 = vmatprep.subr.bf16.mxu1 %v908_v45  ;;  %v929_v61 = vld [vmem:[#allocation8 + $0x8] sm:$0xff]   ;;  %v932_v25 = vld [vmem:[#allocation8 + $0x58] sm:$0xff]  }
  0x56   :  { %v933_v26 = vld [vmem:[#allocation8 + $0x18] sm:$0xff]  }
  0x58   :  { %855 = vmatpush3.bf16.msra.mxu0 %v897_v3  ;;  %396 = vmatpush1.bf16.msra.mxu1 %v910_v46 }
  0x59   :  { %856 = vmatprep.subr.bf16.mxu0 %v898_v7  ;;  %397 = vmatprep.subr.bf16.mxu1 %v911_v47 }
  0x5c   :  { %857 = vmatpush3.bf16.msra.mxu0 %v898_v7  ;;  %398 = vmatpush1.bf16.msra.mxu1 %v913_v48 }
  0x5d   :  { %858 = vmatprep.subr.bf16.mxu0 %v899_v8  ;;  %399 = vmatprep.subr.bf16.mxu1 %v914_v49 }
  0x60   :  { %859 = vmatpush3.bf16.msra.mxu0 %v899_v8  ;;  %400 = vmatpush1.bf16.msra.mxu1 %v916_v50 }
  0x61   :  { %860 = vmatprep.subr.bf16.mxu0 %v900_v9  ;;  %401 = vmatprep.subr.bf16.mxu1 %v917_v51 }
  0x64   :  { %861 = vmatpush3.bf16.msra.mxu0 %v900_v9  ;;  %402 = vmatpush1.bf16.msra.mxu1 %v919_v53  ;;  %v762_v9 = vld [vmem:[%s1299_s3] ss:$0 sm:$0xff] }
  0x65   :  { %862 = vmatprep.subr.bf16.mxu0 %v901_v10  ;;  %403 = vmatprep.subr.bf16.mxu1 %v920_v54 }
  0x68   :  { %863 = vmatpush3.bf16.msra.mxu0 %v901_v10  ;;  %404 = vmatpush1.bf16.msra.mxu1 %v922_v55 }
  0x69   :  { %405 = vmatprep.subr.bf16.mxu1 %v923_v56  ;;  %820 = vmatprep.subr.bf16.mxu0 %v926_v58 }
  0x6b   :  { %865 = vmatmul.mubr.bf16.vlgmr.msra.gmra.mrb[0].mxu0 %v99_v12 }
  0x6c   :  { %406 = vmatpush1.bf16.msra.mxu1 %v925_v57  ;;  %821 = vmatpush3.bf16.msra.mxu0 %v927_v59 }
  0x6d   :  { %868 = vmatprep.subr.bf16.mxu1 %v926_v58  ;;  %822 = vmatprep.subr.bf16.mxu0 %v928_v60 }
  0x70   :  { %823 = vmatpush3.bf16.msra.mxu0 %v929_v61 }
 0x13e   :  { %v866_v14 = vpop.f32.mrb[0].mxu0 }
 0x13f   :  { %v217_v15 = vadd.f32 %v866_v14, %v753_v13  ;;  %v208_v16 = vpop.f32.mrb[1].mxu0  ;;  %v763_v14 = vld [vmem:[%s1300_s4] ss:$0 sm:$0xff] }
 0x140   :  { %v209_v17 = vadd.f32 %v753_v13, %v208_v16  ;;  %v867_v18 = vpop.f32.mrb[2].mxu0 }
 0x141   :  { %v211_v19 = vpop.f32.mrb[3].mxu0  ;;  %v224_v20 = vadd.f32 %v217_v15, %v97_v11 }
 0x142   :  { %v212_v21 = vadd.f32 %v753_v13, %v211_v19  ;;  %v222_v22 = vadd.f32 %v209_v17, %v95_v4 }
 0x143   :  { %231 = vadd.xlane.f32.xlu1 %v224_v20 }
 0x144   :  { %227 = vadd.xlane.f32.xlu0 %v222_v22  ;;  %v223_v23 = vadd.f32 %v212_v21, %v96_v5 }
 0x148   :  { %229 = vadd.xlane.f32.xlu0 %v223_v23 }
 0x1d0   :  { %v232_v28 = vpop.xlane.xlu1 %231 }
 0x1d1   :  { %v235_v29 = vmul.f32 0.015625, %v232_v28  ;;  %v228_v30 = vpop.xlane.xlu0 %227  ;;  %v934_v28 = vld [vmem:[#allocation8 + $0x60] sm:$0xff]  }
 0x1d2   :  { %v233_v32 = vmul.f32 0.015625, %v228_v30  ;;  %v936_v30 = vld [vmem:[#allocation8 + $0x68] sm:$0xff]  }
 0x1d3   :  { %v1221_v33 = vsub.f32 %v224_v20, %v235_v29  ;;  %v935_v29 = vld [vmem:[#allocation8 + $0x20] sm:$0xff]  }
 0x1d4   :  { %v1223_v34 = vsub.f32 %v222_v22, %v233_v32  ;;  %v937_v32 = vld [vmem:[#allocation8 + $0x28] sm:$0xff]  }
 0x1d5   :  { %v230_v35 = vpop.xlane.xlu0 %229  ;;  %v241_v40 = vmul.f32 %v1221_v33, %v1221_v33 }
 0x1d6   :  { %v234_v36 = vmul.f32 0.015625, %v230_v35  ;;  %v239_v37 = vmul.f32 %v1223_v34, %v1223_v34  ;;  %v940_v35 = vld [vmem:[#allocation8 + $0x78] sm:$0xff]  }
 0x1d7   :  { %v244_v42 = vsel %vm102_vm0, %v241_v40, 0.0 }
 0x1d8   :  { %v1228_v38 = vsub.f32 %v223_v23, %v234_v36  ;;  %v242_v39 = vsel %vm102_vm0, %v239_v37, 0.0  ;;  %v930_v23 = vld [vmem:[#allocation8 + $0x50] sm:$0xff]   ;;  %v941_v36 = vld [vmem:[#allocation8 + $0x38] sm:$0xff]   ;;  %v302_v37 = vshrl.u32 %v100_v27, 7 }
 0x1d9   :  { %245 = vadd.xlane.f32.xlu1 %v242_v39  ;;  %824 = vmatprep.subr.bf16.mxu0 %v930_v23  ;;  %v299_v39 = vld [vmem:[%s1302_s6] sm:$0x3] }
 0x1da   :  { %v240_v41 = vmul.f32 %v1228_v38, %v1228_v38  ;;  %825 = vmatpush3.bf16.msra.mxu0 %v931_v24  ;;  %v307_v40 = vsub.s32 1, %v302_v37 }
 0x1db   :  { %826 = vmatprep.subr.bf16.mxu0 %v932_v25 }
 0x1dc   :  { %v243_v43 = vsel %vm102_vm0, %v240_v41, 0.0 }
 0x1dd   :  { %249 = vadd.xlane.f32.xlu1 %v244_v42  ;;  %247 = vadd.xlane.f32.xlu0 %v243_v43  ;;  %v308_v42 = vrot.slane %v299_v39, %v307_v40 }
 0x1de   :  { %827 = vmatpush3.bf16.msra.mxu0 %v933_v26 }
 0x1df   :  { %828 = vmatprep.subr.bf16.mxu0 %v934_v28 }
 0x1e2   :  { %829 = vmatpush3.bf16.msra.mxu0 %v935_v29 }
 0x1e3   :  { %830 = vmatprep.subr.bf16.mxu0 %v936_v30 }
 0x1e6   :  { %831 = vmatpush3.bf16.msra.mxu0 %v937_v32 }
 0x266   :  { %v246_v62 = vpop.xlane.xlu1 %245 }
 0x267   :  { %v251_v63 = vmul.f32 0.015625, %v246_v62 }
 0x269   :  { %v254_v0 = vadd.f32 1e-05, %v251_v63 }
 0x26a   :  { %v250_v1 = vpop.xlane.xlu1 %249  ;;  %v248_v2 = vpop.xlane.xlu0 %247 }
 0x26b   :  { %942 = vrsqrt.f32 %v254_v0  ;;  %v253_v3 = vmul.f32 0.015625, %v250_v1  ;;  %v252_v4 = vmul.f32 0.015625, %v248_v2 }
 0x26d   :  { %v256_v5 = vadd.f32 1e-05, %v253_v3  ;;  %v255_v6 = vadd.f32 1e-05, %v252_v4 }
 0x26f   :  { %944 = vrsqrt.f32 %v256_v5 }
 0x270   :  { %946 = vrsqrt.f32 %v255_v6 }
 0x275   :  { %v943_v7 = vpop.eup %942 }
 0x276   :  { %v260_v8 = vmul.f32 %v943_v7, %v1223_v34  ;;  %v939_v34 = vld [vmem:[#allocation8 + $0x30] sm:$0xff]  }
 0x278   :  { %v269_v13 = vmul.f32 %v762_v9, %v260_v8 }
 0x279   :  { %v945_v10 = vpop.eup %944 }
 0x27a   :  { %v947_v11 = vpop.eup %946  ;;  %v262_v16 = vmul.f32 %v945_v10, %v1221_v33  ;;  %v1249_v17 = vadd.f32 %v763_v14, %v269_v13  ;;  %v938_v33 = vld [vmem:[#allocation8 + $0x70] sm:$0xff]  }
 0x27b   :  { %v261_v12 = vmul.f32 %v947_v11, %v1228_v38  ;;  %832 = vmatprep.subr.bf16.mxu0 %v938_v33  ;;  %v303_v38 = vsub.s32 0, %v302_v37 }
 0x27c   :  { %v271_v20 = vmul.f32 %v762_v9, %v262_v16  ;;  %833 = vmatpush3.bf16.msra.mxu0 %v939_v34 }
 0x27d   :  { %v270_v15 = vmul.f32 %v762_v9, %v261_v12  ;;  %834 = vmatprep.subr.bf16.mxu0 %v940_v35  ;;  %v304_v41 = vrot.slane %v299_v39, %v303_v38 }
 0x27e   :  { %v1255_v21 = vadd.f32 %v763_v14, %v271_v20 }
 0x27f   :  { %v1251_v18 = vadd.f32 %v763_v14, %v270_v15 }
 0x280   :  { %v282_v22 = vpack.c.bf16 %v1255_v21, %v1255_v21  ;;  %835 = vmatpush3.bf16.msra.mxu0 %v941_v36 }
 0x281   :  { %v281_v19 = vpack.c.bf16 %v1251_v18, %v1249_v17 }
 0x283   :  { %424 = vmatmul.mubr.bf16.vlgmr.msra.gmra.mrb[0].mxu1 %v281_v19 }
 0x284   :  { %433 = vmatprep.mubr.bf16.mxu1 %v1092_v52  ;;  %876 = vmatpush3.bf16.msra.mxu1 %v927_v59 }
 0x285   :  { %869 = vmatprep.subr.bf16.mxu1 %v928_v60 }
 0x288   :  { %877 = vmatpush3.bf16.msra.mxu1 %v929_v61 }
 0x289   :  { %870 = vmatprep.subr.bf16.mxu1 %v930_v23 }
 0x28b   :  { %434 = vmatmul.mubr.bf16.gmra.mrb[4].mxu1 %v282_v22 }
 0x28c   :  { %878 = vmatpush3.bf16.msra.mxu1 %v931_v24 }
 0x28d   :  { %871 = vmatprep.subr.bf16.mxu1 %v932_v25 }
 0x290   :  { %879 = vmatpush3.bf16.msra.mxu1 %v933_v26 }
 0x291   :  { %872 = vmatprep.subr.bf16.mxu1 %v934_v28 }
 0x294   :  { %880 = vmatpush3.bf16.msra.mxu1 %v935_v29 }
 0x295   :  { %873 = vmatprep.subr.bf16.mxu1 %v936_v30 }
 0x298   :  { %881 = vmatpush3.bf16.msra.mxu1 %v937_v32  ;;  %v780_v32 = vld [vmem:[%s1304_s8] ss:$0 sm:$0xff] }
 0x299   :  { %874 = vmatprep.subr.bf16.mxu1 %v938_v33 }
 0x29c   :  { %882 = vmatpush3.bf16.msra.mxu1 %v939_v34 }
 0x29d   :  { %875 = vmatprep.subr.bf16.mxu1 %v940_v35 }
 0x2a0   :  { %883 = vmatpush3.bf16.msra.mxu1 %v941_v36 }
 0x356   :  { %v425_v43 = vpop.f32.mrb[0].mxu1 }
 0x357   :  { %v426_v44 = vadd.f32 %v425_v43, %v304_v41  ;;  %v427_v45 = vpop.f32.mrb[1].mxu1 }
 0x358   :  { %v428_v46 = vadd.f32 %v427_v45, %v308_v42  ;;  %v429_v47 = vpop.f32.mrb[2].mxu1 }
 0x359   :  { %v448_v48 = vmul.f32 0.70710677, %v426_v44  ;;  %v430_v49 = vadd.f32 %v429_v47, %v304_v41  ;;  %v431_v50 = vpop.f32.mrb[3].mxu1  ;;  %v442_v4 = vmul.f32 0.5, %v426_v44 }
 0x35a   :  { %v449_v51 = vmul.f32 0.70710677, %v428_v46  ;;  %v432_v52 = vadd.f32 %v431_v50, %v308_v42  ;;  %v443_v7 = vmul.f32 0.5, %v428_v46 }
 0x35b   :  { %948 = verf.f32 %v448_v48  ;;  %v450_v27 = vmul.f32 0.70710677, %v430_v49  ;;  %v444_v5 = vmul.f32 0.5, %v430_v49 }
 0x35c   :  { %950 = verf.f32 %v449_v51  ;;  %v451_v53 = vmul.f32 0.70710677, %v432_v52  ;;  %v445_v8 = vmul.f32 0.5, %v432_v52 }
 0x35d   :  { %952 = verf.f32 %v450_v27 }
 0x35e   :  { %954 = verf.f32 %v451_v53  ;;  %v435_v54 = vpop.f32.mrb[4].mxu1 }
 0x35f   :  { %v436_v55 = vadd.f32 %v435_v54, %v304_v41  ;;  %v437_v56 = vpop.f32.mrb[5].mxu1 }
 0x360   :  { %v438_v57 = vadd.f32 %v437_v56, %v308_v42  ;;  %v439_v58 = vpop.f32.mrb[6].mxu1 }
 0x361   :  { %v452_v59 = vmul.f32 0.70710677, %v436_v55  ;;  %v440_v60 = vpop.f32.mrb[7].mxu1  ;;  %v446_v20 = vmul.f32 0.5, %v436_v55 }
 0x362   :  { %v453_v61 = vmul.f32 0.70710677, %v438_v57  ;;  %v447_v23 = vmul.f32 0.5, %v438_v57 }
 0x363   :  { %956 = verf.f32 %v452_v59 }
 0x364   :  { %958 = verf.f32 %v453_v61 }
 0x365   :  { %v949_v62 = vpop.eup %948 }
 0x366   :  { %v951_v63 = vpop.eup %950  ;;  %v460_v0 = vadd.f32 1.0, %v949_v62 }
 0x367   :  { %v953_v1 = vpop.eup %952  ;;  %v461_v2 = vadd.f32 1.0, %v951_v63 }
 0x368   :  { %v955_v3 = vpop.eup %954  ;;  %v462_v6 = vadd.f32 1.0, %v953_v1  ;;  %v466_v10 = vmul.f32 %v460_v0, %v442_v4 }
 0x369   :  { %v463_v9 = vadd.f32 1.0, %v955_v3  ;;  %v467_v12 = vmul.f32 %v461_v2, %v443_v7 }
 0x36a   :  { %v468_v11 = vmul.f32 %v462_v6, %v444_v5  ;;  %v797_v6 = vld [vmem:[%s1305_s9] ss:$0 sm:$0xff]  ;;  %s1054_s9 = scalar_lea.vmem %s740_s21, 192 }
 0x36b   :  { %v469_v13 = vmul.f32 %v463_v9, %v445_v8  ;;  %p1055_p4 = scmp.ne.s32.totalorder %s740_s21, %s1054_s9  ;;  %p1060_p6 = scmp.lt.s32.totalorder %s1054_s9, %s1054_s9 }
 0x36c   :  { %v472_v14 = vpack.c.bf16 %v468_v11, %v466_v10  ;;  %v798_v10 = vld [vmem:[%s1306_s10] ss:$0 sm:$0xff] }
 0x36d   :  { %v957_v15 = vpop.eup %956  ;;  %v473_v16 = vpack.c.bf16 %v469_v13, %v467_v12  ;;  %p1061_p7 = por %p1060_p6, %p1059_p5 }
 0x36e   :  { %v959_v19 = vpop.eup %958  ;;  %v464_v22 = vadd.f32 1.0, %v957_v15 }
 0x36f   :  { %v465_v24 = vadd.f32 1.0, %v959_v19  ;;  %643 = vmatprep.mubr.bf16.mxu0 %v473_v16  ;;  %p1062_p8 = pnand %p1061_p7, %p1055_p4 }
 0x370   :  { %v470_v25 = vmul.f32 %v464_v22, %v446_v20  ;;  %644 = vmatmul.mubr.bf16.vlgmr.msra.gmra.mrb[4].mxu0 %v472_v14 }
 0x371   :  { %v471_v26 = vmul.f32 %v465_v24, %v447_v23 }
 0x372   :  { %v474_v29 = vpack.c.bf16 %v470_v25, %v470_v25 }
 0x373   :  { %v475_v28 = vpack.c.bf16 %v471_v26, %v471_v26 }
 0x375   :  { %651 = vmatprep.mubr.bf16.mxu1 %v475_v28 }
 0x376   :  { %652 = vmatmul.mubr.bf16.vlgmr.msra.gmra.mrb[8].mxu1 %v474_v29 }
 0x443   :  { %v836_v30 = vpop.f32.mrb[4].mxu0 }
 0x444   :  { %v837_v33 = vpop.f32.mrb[5].mxu0 }
 0x445   :  { %v838_v34 = vadd.f32 %v837_v33, %v836_v30  ;;  %v839_v35 = vpop.f32.mrb[6].mxu0 }
 0x446   :  { %v840_v36 = vpop.f32.mrb[7].mxu0 }
 0x447   :  { %v646_v37 = vadd.f32 %v838_v34, %v780_v32  ;;  %v841_v38 = vadd.f32 %v840_v36, %v839_v35 }
 0x449   :  { %v649_v39 = vadd.f32 %v841_v38, %v780_v32  ;;  %v842_v40 = vpop.f32.mrb[8].mxu1  ;;  %v659_v41 = vadd.f32 %v646_v37, %v1249_v17 }
 0x44a   :  { %v843_v42 = vpop.f32.mrb[9].mxu1 }
 0x44b   :  { %v844_v43 = vadd.f32 %v843_v42, %v842_v40  ;;  %v845_v44 = vpop.f32.mrb[10].mxu1  ;;  %664 = vadd.xlane.f32.xlu0 %v659_v41  ;;  %v660_v45 = vadd.f32 %v649_v39, %v1251_v18 }
 0x44c   :  { %v846_v46 = vpop.f32.mrb[11].mxu1 }
 0x44d   :  { %v654_v47 = vadd.f32 %v844_v43, %v780_v32  ;;  %666 = vadd.xlane.f32.xlu1 %v660_v45 }
 0x44f   :  { %v661_v48 = vadd.f32 %v654_v47, %v1255_v21 }
 0x451   :  { %668 = vadd.xlane.f32.xlu0 %v661_v48 }
 0x4d8   :  { %v665_v49 = vpop.xlane.xlu0 %664 }
 0x4d9   :  { %v670_v50 = vmul.f32 0.015625, %v665_v49 }
 0x4da   :  { %v667_v51 = vpop.xlane.xlu1 %666 }
 0x4db   :  { %v673_v52 = vsub.f32 %v659_v41, %v670_v50  ;;  %v671_v27 = vmul.f32 0.015625, %v667_v51 }
 0x4dd   :  { %v674_v53 = vsub.f32 %v660_v45, %v671_v27  ;;  %v676_v54 = vmul.f32 %v673_v52, %v673_v52 }
 0x4de   :  { %v669_v17 = vpop.xlane.xlu0 %668 }
 0x4df   :  { %v672_v55 = vmul.f32 0.015625, %v669_v17  ;;  %v679_v56 = vsel %vm102_vm0, %v676_v54, 0.0  ;;  %v677_v57 = vmul.f32 %v674_v53, %v674_v53 }
 0x4e0   :  { %682 = vadd.xlane.f32.xlu1 %v679_v56 }
 0x4e1   :  { %v675_v18 = vsub.f32 %v661_v48, %v672_v55  ;;  %v680_v58 = vsel %vm102_vm0, %v677_v57, 0.0 }
 0x4e2   :  { %684 = vadd.xlane.f32.xlu0 %v680_v58 }
 0x4e3   :  { %v678_v21 = vmul.f32 %v675_v18, %v675_v18 }
 0x4e5   :  { %v681_v59 = vsel %vm102_vm0, %v678_v21, 0.0 }
 0x4e6   :  { %686 = vadd.xlane.f32.xlu1 %v681_v59 }
 0x56d   :  { %v683_v60 = vpop.xlane.xlu1 %682 }
 0x56e   :  { %v688_v61 = vmul.f32 0.015625, %v683_v60 }
 0x56f   :  { %v685_v62 = vpop.xlane.xlu0 %684 }
 0x570   :  { %v691_v63 = vadd.f32 1e-05, %v688_v61  ;;  %v689_v0 = vmul.f32 0.015625, %v685_v62 }
 0x572   :  { %960 = vrsqrt.f32 %v691_v63  ;;  %v692_v1 = vadd.f32 1e-05, %v689_v0 }
 0x573   :  { %v687_v2 = vpop.xlane.xlu1 %686 }
 0x574   :  { %962 = vrsqrt.f32 %v692_v1  ;;  %v690_v3 = vmul.f32 0.015625, %v687_v2 }
 0x576   :  { %v693_v4 = vadd.f32 1e-05, %v690_v3 }
 0x578   :  { %964 = vrsqrt.f32 %v693_v4 }
 0x57c   :  { %v961_v5 = vpop.eup %960 }
 0x57d   :  { %v697_v31 = vmul.f32 %v961_v5, %v673_v52 }
 0x57e   :  { %v963_v7 = vpop.eup %962 }
 0x57f   :  { %v698_v8 = vmul.f32 %v963_v7, %v674_v53  ;;  %v706_v9 = vmul.f32 %v797_v6, %v697_v31 }
 0x581   :  { %v707_v11 = vmul.f32 %v797_v6, %v698_v8  ;;  %v715_v14 = vadd.f32 %v798_v10, %v706_v9 }
 0x582   :  { %v965_v12 = vpop.eup %964 }
 0x583   :  { %v699_v13 = vmul.f32 %v965_v12, %v675_v18  ;;  %v716_v15 = vadd.f32 %v798_v10, %v707_v11 }
 0x585   :  { %v708_v16 = vmul.f32 %v797_v6, %v699_v13  ;;  %v808_v19 = vpack.c.bf16 %v716_v15, %v715_v14 }
 0x587   :  { %v717_v20 = vadd.f32 %v798_v10, %v708_v16  ;;  %809 = vst [vmem:[#allocation10] sm:$0xff] %v808_v19  }
 0x589   :  { %v804_v22 = vpack.c.bf16 %v717_v20, %v717_v20 }
 0x58b   :  { %733 = vst [vmem:[#allocation10 + $0x8] sm:$0xf] %v804_v22 }
 0x58c   :  { %1065 = shalt.err (!%p1062_p8)
}
 0x58d   :  { %s1066_s23 = scalar_lea.hbm %s1307_s11, 192 }
 0x58e   :  { %p1067_p9 = scmp.ne.s32.totalorder %s1307_s11, %s1066_s23  ;;  %p1070_p10 = scmp.lt.u32.totalorder %s1066_s23, %s1307_s11 }
 0x590   :  { %p1072_p11 = pnand %p1070_p10, %p1067_p9 }
 0x592   :  { %1075 = shalt.err (!%p1072_p11)
}
 0x593   :  { %745 = dma.vmem_to_hbm [thread:$0]  %s740_s21, 192, %s1307_s11, [#allocation4], %s1085_s27, %s1085_s27, %s1086_s28  }
 0x594   :  { %1082 = dma.done.wait [#allocation4], 192  }
 0x595   :  { %1083 = vsyncadd [#allocation4], 4294967104 }
 0x596   :  { %749 = vsyncpa [#allocation3], 1 }
 0x597   :  { %750 = vsyncpa [#allocation6], 1 }
 0x598   :  { %751 = vsyncpa [#allocation9], 1 }
 0x599   :  { %752 = vsyncpa [#allocation4], 1 }

</bundles_post_ra>
